<compile_context>
chip_gen: v6e
topology: v6e:2x2x1
jax: 0.10.0
libtpu: 0.0.40
codegen_flags: <defaults>
</compile_context>

<pallas_src>
import functools
import math

import jax
import jax.numpy as jnp
from jax.experimental import pallas as pl
from jax.experimental.pallas import tpu as pltpu

_NEG_INF = -1e30


# ----------------------------------------------------------------------------
# Pallas kernel: NewEncoder forward for a block of TM news items
#   word_att = MultiHeadSelfAttention(x)                       (TM, n, V)
#   w        = softmax( tanh(word_att @ W1 + b1) @ W2 + b2 )   (TM, n, 1)
#   out      = sum_n word_att * w                              (TM, V)
# ----------------------------------------------------------------------------
def _new_encoder_kernel(x_ref, wqkv_ref, w1_ref, b1_ref, w2_ref, b2_ref, o_ref,
                        *, num_heads, dk, dv, K, V, n_valid):
    tm, n, D = x_ref.shape

    # Fused Q/K/V projection: one (tm*n, D) x (D, 2K+V) MXU pass.
    x2 = x_ref[...].reshape(tm * n, D)
    qkv = jnp.dot(x2, wqkv_ref[...], preferred_element_type=jnp.float32)
    qkv = qkv.reshape(tm, n, 2 * K + V)
    q = qkv[:, :, :K]
    k = qkv[:, :, K:2 * K]
    v = qkv[:, :, 2 * K:]

    scale = 1.0 / math.sqrt(dk)
    masked = n_valid < n              # static: only true when seq was padded
    if masked:
        key_mask = jax.lax.broadcasted_iota(jnp.int32, (1, 1, n), 2) < n_valid

    # Per-head attention, batched over the item axis (static head loop).
    heads = []
    for h in range(num_heads):
        qh = q[:, :, h * dk:(h + 1) * dk]
        kh = k[:, :, h * dk:(h + 1) * dk]
        vh = v[:, :, h * dv:(h + 1) * dv]
        dist = jnp.einsum('bqd,bkd->bqk', qh, kh,
                          preferred_element_type=jnp.float32) * scale
        if masked:
            dist = jnp.where(key_mask, dist, _NEG_INF)
        dist = dist - jnp.max(dist, axis=-1, keepdims=True)
        p = jnp.exp(dist)
        p = p / jnp.sum(p, axis=-1, keepdims=True)           # softmax(dim=3)
        heads.append(jnp.einsum('bqk,bkd->bqd', p, vh,
                                preferred_element_type=jnp.float32))
    word_att = jnp.concatenate(heads, axis=-1)               # (tm, n, V)

    # tanh-MLP attention pooling.
    h1 = jnp.tanh(
        jnp.dot(word_att.reshape(tm * n, V), w1_ref[...],
                preferred_element_type=jnp.float32) + b1_ref[...])
    h1 = h1.reshape(tm, n, h1.shape[-1])
    # Width-1 projection on the VPU (lane reduce) instead of a 1-lane MXU pass.
    logits = jnp.sum(h1 * w2_ref[...], axis=-1, keepdims=True) + b2_ref[...]
    if masked:
        row_mask = jax.lax.broadcasted_iota(jnp.int32, (1, n, 1), 1) < n_valid
        logits = jnp.where(row_mask, logits, _NEG_INF)
    logits = logits - jnp.max(logits, axis=1, keepdims=True)
    e = jnp.exp(logits)
    w = e / jnp.sum(e, axis=1, keepdims=True)                # softmax over n

    o_ref[...] = jnp.sum(word_att * w, axis=1)               # (tm, V) slab


def new_encoder(x, params, num_heads, *, block_items=8):
    """x: (num_items, n, D) f32  ->  (num_items, V) f32  (NewEncoder.forward)."""
    wq, wk, wv, w1, b1, w2, b2 = params
    num_items, n_valid, D = x.shape
    K, V, H = wq.shape[1], wv.shape[1], w1.shape[1]
    dk, dv = K // num_heads, V // num_heads

    # Pad the sequence axis to a sublane multiple (masked inside the kernel)
    # and the item axis to a multiple of the per-step item block.
    n_pad = ((n_valid + 7) // 8) * 8
    tm = block_items
    m_pad = ((num_items + tm - 1) // tm) * tm
    if (n_pad, m_pad) != (n_valid, num_items):
        x = jnp.pad(x, ((0, m_pad - num_items), (0, n_pad - n_valid), (0, 0)))

    wqkv = jnp.concatenate([wq, wk, wv], axis=1)      # (D, 2K+V) fused proj
    w2_row = jnp.transpose(w2)                        # (1, H) for VPU reduce

    kern = functools.partial(_new_encoder_kernel, num_heads=num_heads,
                             dk=dk, dv=dv, K=K, V=V, n_valid=n_valid)

    out = pl.pallas_call(
        kern,
        out_shape=jax.ShapeDtypeStruct((m_pad, V), jnp.float32),
        grid=(m_pad // tm,),
        in_specs=[
            pl.BlockSpec((tm, n_pad, D), lambda i: (i, 0, 0)),   # item block
            pl.BlockSpec((D, 2 * K + V), lambda i: (0, 0)),      # fused Wqkv
            pl.BlockSpec((V, H), lambda i: (0, 0)),              # W1
            pl.BlockSpec((1, H), lambda i: (0, 0)),              # b1
            pl.BlockSpec((1, H), lambda i: (0, 0)),              # W2^T
            pl.BlockSpec((1, 1), lambda i: (0, 0)),              # b2
        ],
        out_specs=pl.BlockSpec((tm, V), lambda i: (i, 0)),
        compiler_params=pltpu.CompilerParams(
            dimension_semantics=("parallel",)),
    )(x, wqkv, w1, b1, w2_row, b2)
    return out[:num_items]


# ----------------------------------------------------------------------------
# Pure-JAX reference NewEncoder (for correctness check)
# ----------------------------------------------------------------------------
def new_encoder_ref(x, params, num_heads):
    wq, wk, wv, w1, b1, w2, b2 = params
    m, n, _ = x.shape
    dk = wq.shape[1] // num_heads
    dv = wv.shape[1] // num_heads
    hi = jax.lax.Precision.HIGHEST
    q = jnp.matmul(x, wq, precision=hi).reshape(m, n, num_heads, dk).transpose(0, 2, 1, 3)
    k = jnp.matmul(x, wk, precision=hi).reshape(m, n, num_heads, dk).transpose(0, 2, 1, 3)
    v = jnp.matmul(x, wv, precision=hi).reshape(m, n, num_heads, dv).transpose(0, 2, 1, 3)
    dist = jnp.einsum('mhqd,mhkd->mhqk', q, k, precision=hi) / math.sqrt(dk)
    att = jnp.einsum('mhqk,mhkd->mhqd', jax.nn.softmax(dist, axis=-1), v, precision=hi)
    word_att = att.transpose(0, 2, 1, 3).reshape(m, n, -1)
    h1 = jnp.tanh(jnp.matmul(word_att, w1, precision=hi) + b1)
    logits = (jnp.matmul(h1, w2, precision=hi) + b2)[..., 0]
    w = jax.nn.softmax(logits, axis=-1)[..., None]
    return jnp.sum(word_att * w, axis=1)


# ----------------------------------------------------------------------------
# SMFF forward (glue around the NewEncoder; encoder_fn is swappable)
# ----------------------------------------------------------------------------
def smff_forward(params, his_tit, his_abs, his_cate, his_subcate,
                 imp_tit, imp_abs, imp_cate, imp_subcate, *,
                 encoder_fn=new_encoder):
    glove = params["glove"]
    cate_e = params["cate"]
    sub_e = params["subcate"]
    nh = params["num_heads"]
    wt = params["wt"]
    wa = params["wa"]
    nep = params["news_enc"]
    uep = params["user_enc"]

    his_tit_emb = glove[his_tit]                    # (B, NHis, Lt, D)
    his_abs_emb = glove[his_abs]                    # (B, NHis, La, D)
    imp_tit_emb = glove[imp_tit]                    # (B, NI,   Lt, D)
    imp_abs_emb = glove[imp_abs]                    # (B, NI,   La, D)
    his_cate_emb = jnp.concatenate([cate_e[his_cate], sub_e[his_subcate]], axis=2)[:, :, None, :]
    imp_cate_emb = jnp.concatenate([cate_e[imp_cate], sub_e[imp_subcate]], axis=2)[:, :, None, :]

    input1 = jnp.concatenate([his_cate_emb, his_tit_emb], axis=2)  # (B, NHis, 1+Lt, D)
    input2 = jnp.concatenate([imp_cate_emb, imp_tit_emb], axis=2)  # (B, NI,   1+Lt, D)
    input3 = jnp.concatenate([his_cate_emb, his_abs_emb], axis=2)  # (B, NHis, 1+La, D)
    input4 = jnp.concatenate([imp_cate_emb, imp_abs_emb], axis=2)  # (B, NI,   1+La, D)

    def run_news_pair(a, b):
        # Merge his + imp items of the same sequence length into ONE encoder call.
        B, Ma, n, D = a.shape
        Mb = b.shape[1]
        x = jnp.concatenate([a.reshape(B * Ma, n, D),
                             b.reshape(B * Mb, n, D)], axis=0)
        out = encoder_fn(x, nep, nh)
        return out[:B * Ma].reshape(B, Ma, -1), out[B * Ma:].reshape(B, Mb, -1)

    his_tit_enc, imp_tit_enc = run_news_pair(input1, input2)      # title call
    his_abs_enc, imp_abs_enc = run_news_pair(input3, input4)      # abstract call

    user_emb = wt * his_tit_enc + wa * his_abs_enc  # (B, NHis, V)
    user = encoder_fn(user_emb, uep, nh)            # (B, V)

    imp = wt * imp_tit_enc + wa * imp_abs_enc       # (B, NI, V)
    score = jnp.sum(user[:, None, :] * imp, axis=2) # (B, NI)
    return jax.nn.sigmoid(score)


# ----------------------------------------------------------------------------
# Deterministic parameter setup + example run
# ----------------------------------------------------------------------------
def make_params(key, *, D, K, V, H, num_heads, vocab, cate_size, subcate_size):
    ks = jax.random.split(key, 20)
    cate_len = D // 2

    def enc_params(kbase, din, dk, dv, hidden):
        k0, k1, k2, k3, k4 = jax.random.split(kbase, 5)
        wq = jax.random.normal(k0, (din, dk), jnp.float32) * 0.1
        wk = jax.random.normal(k1, (din, dk), jnp.float32) * 0.1
        wv = jax.random.normal(k2, (din, dv), jnp.float32) * 0.1
        w1 = jax.random.normal(k3, (dv, hidden), jnp.float32) * 0.1
        b1 = jnp.zeros((1, hidden), jnp.float32)
        w2 = jax.random.normal(k4, (hidden, 1), jnp.float32) * 0.1
        b2 = jnp.zeros((1, 1), jnp.float32)
        return (wq, wk, wv, w1, b1, w2, b2)

    return {
        "glove": jax.random.normal(ks[0], (vocab, D), jnp.float32) * 0.1,
        "cate": jax.random.normal(ks[1], (cate_size, cate_len), jnp.float32) * 0.1,
        "subcate": jax.random.normal(ks[2], (subcate_size, cate_len), jnp.float32) * 0.1,
        "news_enc": enc_params(ks[3], D, K, V, H),     # NewEncoder(Q, K, V, heads)
        "user_enc": enc_params(ks[4], V, V, V, H),     # NewEncoder(V, V, V, heads)
        "wt": jax.random.uniform(ks[5], (1,), jnp.float32),
        "wa": jax.random.uniform(ks[6], (1,), jnp.float32),
        "num_heads": num_heads,
    }


if __name__ == "__main__":
    key = jax.random.PRNGKey(0)

    # config: FEATURE_EMB_LENGTH == glove dim == Q == 32, K = V = HIDDEN = 32
    D = K = V = H = 32
    NUM_HEADS = 2
    B, NHis, NI = 2, 3, 4          # batch, history news, impression news
    Lt, La = 7, 11                 # title / abstract token lengths
    VOCAB, CATE, SUBCATE = 50, 6, 9

    params = make_params(key, D=D, K=K, V=V, H=H, num_heads=NUM_HEADS,
                         vocab=VOCAB, cate_size=CATE, subcate_size=SUBCATE)

    ks = jax.random.split(jax.random.PRNGKey(1), 8)
    his_tit = jax.random.randint(ks[0], (B, NHis, Lt), 0, VOCAB)
    his_abs = jax.random.randint(ks[1], (B, NHis, La), 0, VOCAB)
    his_cate = jax.random.randint(ks[2], (B, NHis), 0, CATE)
    his_subcate = jax.random.randint(ks[3], (B, NHis), 0, SUBCATE)
    imp_tit = jax.random.randint(ks[4], (B, NI, Lt), 0, VOCAB)
    imp_abs = jax.random.randint(ks[5], (B, NI, La), 0, VOCAB)
    imp_cate = jax.random.randint(ks[6], (B, NI), 0, CATE)
    imp_subcate = jax.random.randint(ks[7], (B, NI), 0, SUBCATE)

    score = smff_forward(params, his_tit, his_abs, his_cate, his_subcate,
                         imp_tit, imp_abs, imp_cate, imp_subcate)
    jax.block_until_ready(score)

    ref = smff_forward(params, his_tit, his_abs, his_cate, his_subcate,
                       imp_tit, imp_abs, imp_cate, imp_subcate,
                       encoder_fn=new_encoder_ref)
    jax.block_until_ready(ref)

    assert score.shape == (B, NI)
    assert bool(jnp.all(jnp.isfinite(score)))
    assert bool(jnp.max(jnp.abs(score - ref)) < 5e-3), "mismatch vs JAX reference"
    print("KERNEL_OK")
</pallas_src>

<mosaic_0001>
module attributes {stable_mosaic.version = 11 : i64} {
  func.func @_new_encoder_kernel(%arg0: i32, %arg1: memref<8x8x32xf32, #tpu.memory_space<vmem>>, %arg2: memref<32x96xf32, #tpu.memory_space<vmem>>, %arg3: memref<32x32xf32, #tpu.memory_space<vmem>>, %arg4: memref<1x32xf32, #tpu.memory_space<vmem>>, %arg5: memref<1x32xf32, #tpu.memory_space<vmem>>, %arg6: memref<1x1xf32, #tpu.memory_space<vmem>>, %arg7: memref<8x32xf32, #tpu.memory_space<vmem>>) attributes {dimension_semantics = [#tpu.dimension_semantics<parallel>], iteration_bounds = array<i64: 2>, scalar_prefetch = 0 : i64, scratch_operands = 0 : i64, tpu.core_type = #tpu.core_type<tc>, window_params = [{transform_indices = @transform_0, window_bounds = array<i64: 8, 8, 32>}, {pipeline_mode = #tpu.pipeline_mode<synchronous>, transform_indices = @transform_1, window_bounds = array<i64: 32, 96>}, {pipeline_mode = #tpu.pipeline_mode<synchronous>, transform_indices = @transform_2, window_bounds = array<i64: 32, 32>}, {pipeline_mode = #tpu.pipeline_mode<synchronous>, transform_indices = @transform_3, window_bounds = array<i64: 1, 32>}, {pipeline_mode = #tpu.pipeline_mode<synchronous>, transform_indices = @transform_4, window_bounds = array<i64: 1, 32>}, {pipeline_mode = #tpu.pipeline_mode<synchronous>, transform_indices = @transform_5, window_bounds = array<i64: 1, 1>}, {transform_indices = @transform_6, window_bounds = array<i64: 8, 32>}]} {
    %c0 = arith.constant 0 : index
    %c0_0 = arith.constant 0 : index
    %c0_1 = arith.constant 0 : index
    %0 = vector.load %arg1[%c0, %c0_0, %c0_1] : memref<8x8x32xf32, #tpu.memory_space<vmem>>, vector<8x8x32xf32>
    %1 = vector.shape_cast %0 : vector<8x8x32xf32> to vector<64x32xf32>
    %c0_2 = arith.constant 0 : index
    %c0_3 = arith.constant 0 : index
    %2 = vector.load %arg2[%c0_2, %c0_3] : memref<32x96xf32, #tpu.memory_space<vmem>>, vector<32x96xf32>
    %cst = arith.constant dense<0.000000e+00> : vector<64x96xf32>
    %3 = tpu.matmul %1, %2, %cst {dimension_numbers = #tpu.dot_dimension_numbers<[1], [0], [0], [1], [0, 0, 1, 1], [], []>} : vector<64x32xf32>, vector<32x96xf32>, vector<64x96xf32> -> vector<64x96xf32>
    %4 = vector.shape_cast %3 : vector<64x96xf32> to vector<8x8x96xf32>
    %5 = vector.extract_strided_slice %4 {offsets = [0, 0, 0], sizes = [8, 8, 32], strides = [1, 1, 1]} : vector<8x8x96xf32> to vector<8x8x32xf32>
    %6 = vector.extract_strided_slice %4 {offsets = [0, 0, 32], sizes = [8, 8, 32], strides = [1, 1, 1]} : vector<8x8x96xf32> to vector<8x8x32xf32>
    %7 = vector.extract_strided_slice %4 {offsets = [0, 0, 64], sizes = [8, 8, 32], strides = [1, 1, 1]} : vector<8x8x96xf32> to vector<8x8x32xf32>
    %8 = vector.extract_strided_slice %5 {offsets = [0, 0, 0], sizes = [8, 8, 16], strides = [1, 1, 1]} : vector<8x8x32xf32> to vector<8x8x16xf32>
    %9 = vector.extract_strided_slice %6 {offsets = [0, 0, 0], sizes = [8, 8, 16], strides = [1, 1, 1]} : vector<8x8x32xf32> to vector<8x8x16xf32>
    %10 = vector.extract_strided_slice %7 {offsets = [0, 0, 0], sizes = [8, 8, 16], strides = [1, 1, 1]} : vector<8x8x32xf32> to vector<8x8x16xf32>
    "tpu.trace_start"() <{level = 10 : i32, message = "bqd,bkd->bqk"}> : () -> ()
    %cst_4 = arith.constant dense<0.000000e+00> : vector<8x8x8xf32>
    %11 = tpu.matmul %8, %9, %cst_4 {dimension_numbers = #tpu.dot_dimension_numbers<[2], [2], [1], [1], [0, 0, 0, 1, 1, 1], [0], [0]>} : vector<8x8x16xf32>, vector<8x8x16xf32>, vector<8x8x8xf32> -> vector<8x8x8xf32>
    "tpu.trace_stop"() : () -> ()
    %cst_5 = arith.constant 2.500000e-01 : f32
    %12 = vector.broadcast %cst_5 : f32 to vector<8x8x8xf32>
    %13 = arith.mulf %11, %12 : vector<8x8x8xf32>
    %cst_6 = arith.constant dense<0xFF800000> : vector<8x8xf32>
    %14 = vector.multi_reduction <maximumf>, %13, %cst_6 [2] : vector<8x8x8xf32> to vector<8x8xf32>
    %15 = vector.shape_cast %14 : vector<8x8xf32> to vector<8x8x1xf32>
    %16 = vector.broadcast %15 : vector<8x8x1xf32> to vector<8x8x8xf32>
    %17 = arith.subf %13, %16 : vector<8x8x8xf32>
    %18 = math.exp %17 : vector<8x8x8xf32>
    %cst_7 = arith.constant dense<0.000000e+00> : vector<8x8xf32>
    %19 = vector.multi_reduction <add>, %18, %cst_7 [2] : vector<8x8x8xf32> to vector<8x8xf32>
    %20 = vector.shape_cast %19 : vector<8x8xf32> to vector<8x8x1xf32>
    %21 = vector.broadcast %20 : vector<8x8x1xf32> to vector<8x8x8xf32>
    %22 = arith.divf %18, %21 : vector<8x8x8xf32>
    "tpu.trace_start"() <{level = 10 : i32, message = "bqk,bkd->bqd"}> : () -> ()
    %cst_8 = arith.constant dense<0.000000e+00> : vector<8x8x16xf32>
    %23 = tpu.matmul %22, %10, %cst_8 {dimension_numbers = #tpu.dot_dimension_numbers<[2], [1], [1], [2], [0, 0, 0, 1, 1, 2], [0], [0]>} : vector<8x8x8xf32>, vector<8x8x16xf32>, vector<8x8x16xf32> -> vector<8x8x16xf32>
    "tpu.trace_stop"() : () -> ()
    %24 = vector.extract_strided_slice %5 {offsets = [0, 0, 16], sizes = [8, 8, 16], strides = [1, 1, 1]} : vector<8x8x32xf32> to vector<8x8x16xf32>
    %25 = vector.extract_strided_slice %6 {offsets = [0, 0, 16], sizes = [8, 8, 16], strides = [1, 1, 1]} : vector<8x8x32xf32> to vector<8x8x16xf32>
    %26 = vector.extract_strided_slice %7 {offsets = [0, 0, 16], sizes = [8, 8, 16], strides = [1, 1, 1]} : vector<8x8x32xf32> to vector<8x8x16xf32>
    "tpu.trace_start"() <{level = 10 : i32, message = "bqd,bkd->bqk"}> : () -> ()
    %cst_9 = arith.constant dense<0.000000e+00> : vector<8x8x8xf32>
    %27 = tpu.matmul %24, %25, %cst_9 {dimension_numbers = #tpu.dot_dimension_numbers<[2], [2], [1], [1], [0, 0, 0, 1, 1, 1], [0], [0]>} : vector<8x8x16xf32>, vector<8x8x16xf32>, vector<8x8x8xf32> -> vector<8x8x8xf32>
    "tpu.trace_stop"() : () -> ()
    %cst_10 = arith.constant 2.500000e-01 : f32
    %28 = vector.broadcast %cst_10 : f32 to vector<8x8x8xf32>
    %29 = arith.mulf %27, %28 : vector<8x8x8xf32>
    %cst_11 = arith.constant dense<0xFF800000> : vector<8x8xf32>
    %30 = vector.multi_reduction <maximumf>, %29, %cst_11 [2] : vector<8x8x8xf32> to vector<8x8xf32>
    %31 = vector.shape_cast %30 : vector<8x8xf32> to vector<8x8x1xf32>
    %32 = vector.broadcast %31 : vector<8x8x1xf32> to vector<8x8x8xf32>
    %33 = arith.subf %29, %32 : vector<8x8x8xf32>
    %34 = math.exp %33 : vector<8x8x8xf32>
    %cst_12 = arith.constant dense<0.000000e+00> : vector<8x8xf32>
    %35 = vector.multi_reduction <add>, %34, %cst_12 [2] : vector<8x8x8xf32> to vector<8x8xf32>
    %36 = vector.shape_cast %35 : vector<8x8xf32> to vector<8x8x1xf32>
    %37 = vector.broadcast %36 : vector<8x8x1xf32> to vector<8x8x8xf32>
    %38 = arith.divf %34, %37 : vector<8x8x8xf32>
    "tpu.trace_start"() <{level = 10 : i32, message = "bqk,bkd->bqd"}> : () -> ()
    %cst_13 = arith.constant dense<0.000000e+00> : vector<8x8x16xf32>
    %39 = tpu.matmul %38, %26, %cst_13 {dimension_numbers = #tpu.dot_dimension_numbers<[2], [1], [1], [2], [0, 0, 0, 1, 1, 2], [0], [0]>} : vector<8x8x8xf32>, vector<8x8x16xf32>, vector<8x8x16xf32> -> vector<8x8x16xf32>
    "tpu.trace_stop"() : () -> ()
    %40 = tpu.concatenate %23, %39 in 2 : vector<8x8x16xf32>, vector<8x8x16xf32> -> vector<8x8x32xf32>
    %41 = vector.shape_cast %40 : vector<8x8x32xf32> to vector<64x32xf32>
    %c0_14 = arith.constant 0 : index
    %c0_15 = arith.constant 0 : index
    %42 = vector.load %arg3[%c0_14, %c0_15] : memref<32x32xf32, #tpu.memory_space<vmem>>, vector<32x32xf32>
    %cst_16 = arith.constant dense<0.000000e+00> : vector<64x32xf32>
    %43 = tpu.matmul %41, %42, %cst_16 {dimension_numbers = #tpu.dot_dimension_numbers<[1], [0], [0], [1], [0, 0, 1, 1], [], []>} : vector<64x32xf32>, vector<32x32xf32>, vector<64x32xf32> -> vector<64x32xf32>
    %c0_17 = arith.constant 0 : index
    %c0_18 = arith.constant 0 : index
    %44 = vector.load %arg4[%c0_17, %c0_18] : memref<1x32xf32, #tpu.memory_space<vmem>>, vector<1x32xf32>
    %45 = vector.broadcast %44 : vector<1x32xf32> to vector<64x32xf32>
    %46 = arith.addf %43, %45 : vector<64x32xf32>
    %47 = math.tanh %46 : vector<64x32xf32>
    %48 = vector.shape_cast %47 : vector<64x32xf32> to vector<8x8x32xf32>
    %c0_19 = arith.constant 0 : index
    %c0_20 = arith.constant 0 : index
    %49 = vector.load %arg5[%c0_19, %c0_20] : memref<1x32xf32, #tpu.memory_space<vmem>>, vector<1x32xf32>
    %50 = vector.shape_cast %49 : vector<1x32xf32> to vector<1x1x32xf32>
    %51 = vector.broadcast %50 : vector<1x1x32xf32> to vector<8x8x32xf32>
    %52 = arith.mulf %48, %51 : vector<8x8x32xf32>
    %cst_21 = arith.constant dense<0.000000e+00> : vector<8x8xf32>
    %53 = vector.multi_reduction <add>, %52, %cst_21 [2] : vector<8x8x32xf32> to vector<8x8xf32>
    %54 = vector.shape_cast %53 : vector<8x8xf32> to vector<8x8x1xf32>
    %c0_22 = arith.constant 0 : index
    %c0_23 = arith.constant 0 : index
    %55 = vector.load %arg6[%c0_22, %c0_23] : memref<1x1xf32, #tpu.memory_space<vmem>>, vector<1x1xf32>
    %56 = vector.shape_cast %55 : vector<1x1xf32> to vector<1x1x1xf32>
    %57 = vector.broadcast %56 : vector<1x1x1xf32> to vector<8x8x1xf32>
    %58 = arith.addf %54, %57 : vector<8x8x1xf32>
    %cst_24 = arith.constant dense<0xFF800000> : vector<8x1xf32>
    %59 = vector.multi_reduction <maximumf>, %58, %cst_24 [1] : vector<8x8x1xf32> to vector<8x1xf32>
    %60 = vector.shape_cast %59 : vector<8x1xf32> to vector<8x1x1xf32>
    %61 = vector.broadcast %60 : vector<8x1x1xf32> to vector<8x8x1xf32>
    %62 = arith.subf %58, %61 : vector<8x8x1xf32>
    %63 = math.exp %62 : vector<8x8x1xf32>
    %cst_25 = arith.constant dense<0.000000e+00> : vector<8x1xf32>
    %64 = vector.multi_reduction <add>, %63, %cst_25 [1] : vector<8x8x1xf32> to vector<8x1xf32>
    %65 = vector.shape_cast %64 : vector<8x1xf32> to vector<8x1x1xf32>
    %66 = vector.broadcast %65 : vector<8x1x1xf32> to vector<8x8x1xf32>
    %67 = arith.divf %63, %66 : vector<8x8x1xf32>
    %68 = vector.broadcast %67 : vector<8x8x1xf32> to vector<8x8x32xf32>
    %69 = arith.mulf %40, %68 : vector<8x8x32xf32>
    %cst_26 = arith.constant dense<0.000000e+00> : vector<8x32xf32>
    %70 = vector.multi_reduction <add>, %69, %cst_26 [1] : vector<8x8x32xf32> to vector<8x32xf32>
    %c0_27 = arith.constant 0 : index
    %c0_28 = arith.constant 0 : index
    %71 = vector.load %arg7[%c0_27, %c0_28] : memref<8x32xf32, #tpu.memory_space<vmem>>, vector<8x32xf32>
    tpu.vector_store %arg7[%c0_27, %c0_28], %70 {strides = array<i32>} : memref<8x32xf32, #tpu.memory_space<vmem>>, vector<8x32xf32>,
    return
  }
  func.func @transform_0(%arg0: i32) -> (i32, i32, i32) {
    %c0_i32 = arith.constant 0 : i32
    %c0_i32_0 = arith.constant 0 : i32
    %c0_i32_1 = arith.constant 0 : i32
    return %arg0, %c0_i32, %c0_i32_0 : i32, i32, i32
  }
  func.func @transform_1(%arg0: i32) -> (i32, i32) {
    %c0_i32 = arith.constant 0 : i32
    %c0_i32_0 = arith.constant 0 : i32
    %c0_i32_1 = arith.constant 0 : i32
    return %c0_i32, %c0_i32_0 : i32, i32
  }
  func.func @transform_2(%arg0: i32) -> (i32, i32) {
    %c0_i32 = arith.constant 0 : i32
    %c0_i32_0 = arith.constant 0 : i32
    %c0_i32_1 = arith.constant 0 : i32
    return %c0_i32, %c0_i32_0 : i32, i32
  }
  func.func @transform_3(%arg0: i32) -> (i32, i32) {
    %c0_i32 = arith.constant 0 : i32
    %c0_i32_0 = arith.constant 0 : i32
    %c0_i32_1 = arith.constant 0 : i32
    return %c0_i32, %c0_i32_0 : i32, i32
  }
  func.func @transform_4(%arg0: i32) -> (i32, i32) {
    %c0_i32 = arith.constant 0 : i32
    %c0_i32_0 = arith.constant 0 : i32
    %c0_i32_1 = arith.constant 0 : i32
    return %c0_i32, %c0_i32_0 : i32, i32
  }
  func.func @transform_5(%arg0: i32) -> (i32, i32) {
    %c0_i32 = arith.constant 0 : i32
    %c0_i32_0 = arith.constant 0 : i32
    %c0_i32_1 = arith.constant 0 : i32
    return %c0_i32, %c0_i32_0 : i32, i32
  }
  func.func @transform_6(%arg0: i32) -> (i32, i32) {
    %c0_i32 = arith.constant 0 : i32
    %c0_i32_0 = arith.constant 0 : i32
    return %arg0, %c0_i32 : i32, i32
  }
}

</mosaic_0001>

<bundles_post_ra>
// kernel: tpu_custom_call.1
= control target key start
LH: loop header
LB: loop body
LE: loop exit
PB: predicated region body
PF: predicated region fallthrough
CT: control target
= control target key end

     0   :  { %s5159_s0 = inlined_call_operand.hbm [shape: f32[16,8,32], index: 0, kind: input, shape index: {}]   ;;  %s5160_s1 = inlined_call_operand.hbm [shape: f32[32,96], index: 1, kind: input, shape index: {}]   ;;  %s5161_s2 = inlined_call_operand.hbm [shape: f32[32,32], index: 2, kind: input, shape index: {}]   ;;  %s5162_s3 = inlined_call_operand.vmem [shape: f32[1,32], index: 3, kind: input, shape index: {}]   ;;  %s5163_s4 = inlined_call_operand.vmem [shape: f32[1,32], index: 4, kind: input, shape index: {}]   ;;  %s5164_s5 = inlined_call_operand.<no memory space> [shape: f32[1,1], index: 5, kind: input, shape index: {}]   ;;  %s5165_s6 = inlined_call_operand.hbm [shape: f32[16,32], index: 6, kind: output, shape index: {}]  }
   0x1   :  { %v11_v0 = vstv %s5164_s5 }
   0x2   :  { %12 = vst [vmem:[#allocation2] sm:$0x1] %v11_v0 }
   0x3   :  { %13 = vsyncpa [#allocation4], 0 }
   0x4   :  { %15 = vsyncpa [#allocation4 + $0x1], 0 }
   0x5   :  { %16 = vsyncpa [#allocation7], 0 }
   0x6   :  { %17 = vsyncpa [#allocation5], 0 }
   0x7   :  { %19 = vsyncpa [#allocation5 + $0x1], 0  ;;  %s4488_s23 = smov 0   ;;  %s4490_s24 = smov 0  }
   0x8   :  { %s4492_s25 = smov 0   ;;  %s4494_s26 = smov 0  }
   0x9 LB: > { %s4509_s5 = sadd.s32 4294967295, %s4433_s26   ;;  %s3720_s27 = sadd.s32 4294967294, %s4433_s26   ;;  %s4433_s26 = sphi %s4494_s26, %s5188_s26   ;;  %s4429_s25 = sphi %s4492_s25, %s5187_s25   ;;  %s4425_s24 = sphi %s4490_s24, %s5186_s24   ;;  %s4421_s23 = sphi %s4488_s23, %s5185_s23  }
   0xa   : > { %p45_p0 = scmp.ne.s32.totalorder %s4425_s24, %s4421_s23  ;;  %p5166_p1 = scmp.eq.s32.totalorder %s4509_s5, 0 }
   0xb   : > { %p174_p2 = scmp.eq.s32.totalorder %s4509_s5, 1  ;;  %p180_p3 = scmp.eq.s32.totalorder %s3720_s27, 1 }
   0xc   : > { %p4518_p4 = por %p5166_p1, %p45_p0  ;;  %p3721_p5 = scmp.ge.s32.totalorder %s4433_s26, 1 }
   0xd   : > { %p4523_p6 = por %p180_p3, %p45_p0  ;;  %p187_p7 = scmp.lt.s32.totalorder %s4433_s26, 3 }
   0xe   : > { %s5171_s28 = scalar_select %p4518_p4, 1, 0 }
   0xf   : > { %s5172_s29 = scalar_select %p4523_p6, 1, 0 }
  0x10   : > { %p4528_p8 = pnand %p3721_p5, %p187_p7  ;;  %s4435_s7 = smov [#allocation6]  }
  0x11   : > { %s199_s8 = sshll.u32 %s4435_s7, 4  ;;  %s4436_s10 = smov [#allocation8]   ;;  %s200_s8 = int_to_ptr.vmem [resolvable:$true] %s199_s8 }
  0x12   : > { %s5173_s30 = scalar_select %p4528_p8, 1, 0 }
  0x13   : > { %p4105_p9 = pneg %p4528_p8  ;;  %s212_s11 = sshll.u32 %s4436_s10, 4  ;;  %s213_s11 = int_to_ptr.vmem [resolvable:$true] %s212_s11 }
  0x14   : > { %s4296_s12 = scalar_lea.vmem %s200_s8, 512  ;;  %p4304_p5 = scmp.lt.s32.totalorder %s200_s8, %s200_s8 }
  0x15   : > { %p4537_p11 = pnand %p4105_p9, %p5166_p1  ;;  %p4297_p13 = scmp.ne.s32.totalorder %s200_s8, %s4296_s12 }
  0x16   : > { %p4305_p7 = scmp.lt.s32.totalorder %s4296_s12, %s4296_s12 }
  0x17   : > { %p4287_p12 = pneg %p4537_p11 }
  0x18   : > { %p4306_p10 = por %p4305_p7, %p4304_p5 }
  0x19   : > { %p4299_p0 = pnand %p4297_p13, %p4287_p12 }
  0x1b   : > { %p4300_p3 = pneg %p4299_p0 }
  0x1d   : > { %p4307_p9 = pnand %p4306_p10, %p4300_p3 }
  0x1f   : > { %4310 = shalt.err (!%p4307_p9)
}
  0x20   : > { %s5167_s13 = smov 128   ;;  %s4438_s14 = smov 8  }
  0x21   : > { %4108 = dma.hbm_to_vmem [thread:$0]  (!%p4537_p11), %s5160_s1, 512, %s200_s8, [#allocation7], %s5167_s13, %s5167_s13, %s4438_s14  }
  0x22   : > { %s4322_s17 = scalar_lea.vmem %s213_s11, 512  ;;  %p4330_p10 = scmp.lt.s32.totalorder %s213_s11, %s213_s11 }
  0x23   : > { %p4323_p13 = scmp.ne.s32.totalorder %s213_s11, %s4322_s17  ;;  %p4331_p3 = scmp.lt.s32.totalorder %s4322_s17, %s4322_s17 }
  0x25   : > { %p4325_p0 = pnand %p4323_p13, %p4287_p12  ;;  %p4332_p7 = por %p4331_p3, %p4330_p10 }
  0x27   : > { %p4326_p5 = pneg %p4325_p0 }
  0x29   : > { %p4333_p9 = pnand %p4332_p7, %p4326_p5 }
  0x2b   : > { %4336 = shalt.err (!%p4333_p9)
}
  0x2c   : > { %4111 = dma.hbm_to_vmem [thread:$0]  (!%p4537_p11), %s5161_s2, 512, %s213_s11, [#allocation7], %s5167_s13, %s5167_s13, %s4438_s14  }
  0x2d   : > { %s4566_s20 = sadd.s32 1, %s4433_s26   ;;  %s32_s21 = sadd.s32 1, %s4429_s25 }
  0x2e   : > { %s29_s22 = ssub.s32 %s4433_s26, %s4566_s20  ;;  %p39_p12 = scmp.ne.s32.totalorder %s4429_s25, %s4425_s24 }
  0x2f   : > { %p30_p13 = scmp.eq.s32.totalorder %s29_s22, 0  ;;  %p40_p0 = scmp.eq.s32.totalorder %s4433_s26, 0 }
  0x30   : > { %p4576_p5 = por %p174_p2, %p39_p12  ;;  %p4122_p10 = scmp.lt.s32.totalorder %s4433_s26, 2 }
  0x31   : > { %s4582_s7 = scalar_select %p30_p13, %s4429_s25, %s32_s21  }
  0x32   : > { %s5175_s27 = scalar_select %p4576_p5, 1, 0 }
  0x33   : > { %p41_p3 = por %p40_p0, %p39_p12  ;;  %s235_s8 = sand.u32 1, %s4429_s25  }
  0x34   : > { %s3725_s9 = sshll.u32 %s235_s8, 6  ;;  %s3804_s10 = sshll.u32 %s4433_s26, 10 }
  0x35   : > { %s4589_s15 = scalar_lea.hbm %s5159_s0, %s3804_s10  ;;  %s239_s16 = scalar_lea.vmem [#allocation3], %s3725_s9 }
  0x36   : > { %s246_s17 = sshll.u32 %s239_s16, 4  ;;  %p4593_p2 = pnand %p4122_p10, %p41_p3  ;;  %s4591_s17 = int_to_ptr.vmem [resolvable:$true] %s246_s17 }
  0x37   : > { %s4597_s19 = scalar_lea.sflag [#allocation4], %s235_s8  ;;  %s4337_s21 = scalar_lea.hbm %s4589_s15, 1024 }
  0x38   : > { %p4338_p11 = scmp.ne.s32.totalorder %s4589_s15, %s4337_s21  ;;  %p4339_p7 = pneg %p4593_p2 }
  0x39   : > { %s4342_s9 = scalar_lea.hbm %s5159_s0, 2048  ;;  %p4343_p13 = scmp.lt.s32.totalorder %s4589_s15, %s5159_s0 }
  0x3a   : > { %p4340_p9 = pnand %p4339_p7, %p4338_p11  ;;  %p4344_p0 = scmp.lt.s32.totalorder %s4342_s9, %s4337_s21 }
  0x3c   : > { %p4341_p12 = pneg %p4340_p9  ;;  %p4345_p10 = por %p4344_p0, %p4343_p13 }
  0x3e   : > { %p4346_p3 = pnand %p4345_p10, %p4341_p12 }
  0x40   : > { %4349 = shalt.err (!%p4346_p3)
}
  0x41   : > { %s4350_s8 = scalar_lea.vmem %s4591_s17, 1024  ;;  %s4439_s16 = smov [#allocation3]  }
  0x42   : > { %p4351_p1 = scmp.ne.s32.totalorder %s4591_s17, %s4350_s8  ;;  %s4355_s13 = sshll.u32 %s4439_s16, 4  ;;  %s4356_s13 = int_to_ptr.vmem [resolvable:$false] %s4355_s13 }
  0x43   : > { %s4357_s22 = scalar_lea.vmem %s4356_s13, 2048  ;;  %p4358_p9 = scmp.lt.s32.totalorder %s4591_s17, %s4356_s13 }
  0x44   : > { %p4353_p6 = pnand %p4351_p1, %p4339_p7  ;;  %p4359_p5 = scmp.lt.s32.totalorder %s4357_s22, %s4350_s8 }
  0x46   : > { %p4354_p11 = pneg %p4353_p6  ;;  %p4360_p4 = por %p4359_p5, %p4358_p9 }
  0x48   : > { %p4361_p8 = pnand %p4360_p4, %p4354_p11 }
  0x4a   : > { %4364 = shalt.err (!%p4361_p8)
}
  0x4b   : > { %s5177_s21 = smov 128   ;;  %p5178_p1 = scmp.ne.s32.totalorder %s5173_s30, 0 }
  0x4c   : > { %4115 = dma.hbm_to_vmem [thread:$0]  (!%p4593_p2), %s4589_s15, 1024, %s4591_s17, %s4597_s19, %s5177_s21, %s5177_s21, %s4438_s14  }
  0x4d   : > { %258 = sbr.rel (%p5178_p1) target bundleno = 2395 (0x95b), region = 44  ;;  %s4624_s10 = sand.u32 (!%p5178_p1), 1, %s4425_s24  }
  0x4e   : > { %s3729_s13 = sshll.u32 (!%p5178_p1), %s4624_s10, 6  ;;  %s261_s9 = scalar_lea.sflag (!%p5178_p1), [#allocation4], %s4624_s10 }
  0x4f   : > { %s4628_s11 = scalar_lea.vmem (!%p5178_p1), [#allocation3], %s3729_s13  ;;  %p5179_p4 = scmp.ne.s32.totalorder (!%p5178_p1), %s5171_s28, 0 }
  0x52   : > { %4408 = dma.done.wait (%p5179_p4), %s261_s9, 1024  }
  0x53   : > { %4410 = vsyncadd (%p5179_p4), %s261_s9, 4294966272  ;;  %p5180_p6 = scmp.eq.s32.totalorder %s4509_s5, 0 }
  0x55   : > { %4412 = dma.done.wait (%p5180_p6), [#allocation7], 1024   ;;  %p5181_p8 = pmov %p5180_p6 }
  0x56   : > { %vm314_vm0 = vcmask 261120   ;;  %v313_v1 = vld [vmem:[#allocation6 + $0x18] sm:$0xff]  ;;  %v312_v2 = vld [vmem:[#allocation6 + $0x10] sm:$0xff]  ;;  %v302_v3 = vld [vmem:[%s4628_s11] sm:$0xff]  ;;  %v4440_v13 = vmov 0.0   ;;  %vm4441_vm1 = vmmov 0  }
  0x57   : > { %4414 = vsyncadd (%p5181_p8), [#allocation7], 4294966272  ;;  %3893 = vmatprep.subr.mxu0 %v313_v1  ;;  %v311_v4 = vld [vmem:[#allocation6 + $0x8] sm:$0xff]  ;;  %3901 = vmatprep.mubr.msk.f32.mxu0 %vm314_vm0, %v302_v3  ;;  %v310_v5 = vld [vmem:[#allocation6] sm:$0xff]  ;;  %s4442_s28 = smov 96   ;;  %s4443_s30 = smov 64  }
  0x58   : > { %3894 = vmatpush3.msra.mxu0 %v313_v1  ;;  %v303_v6 = vld [vmem:[%s4628_s11 + $0x8] sm:$0xff]  ;;  %v304_v7 = vld [vmem:[%s4628_s11 + $0x10] sm:$0xff]  ;;  %v305_v8 = vld [vmem:[%s4628_s11 + $0x18] sm:$0xff]  ;;  %3923 = vmatprep.subr.mxu1 %v4440_v13  ;;  %vm447_vm2 = vcmask 130048   ;;  %vm1069_vm3 = vcmask 64512   ;;  %s4444_s14 = smov 80  }
  0x59   : > { %3895 = vmatprep.subr.mxu0 %v312_v2  ;;  %v306_v9 = vld [vmem:[%s4628_s11 + $0x20] sm:$0xff]  ;;  %v307_v10 = vld [vmem:[%s4628_s11 + $0x28] sm:$0xff]  ;;  %v308_v11 = vld [vmem:[%s4628_s11 + $0x30] sm:$0xff]  ;;  %3925 = vmatprep.mubr.msk.f32.mxu1 %vm4441_vm1, %v4440_v13  ;;  %s4445_s15 = smov 112   ;;  %s4446_s17 = smov 48   ;;  %vm3336_vm4 = vcmask 7168  }
  0x5a   : > { %3896 = vmatpush3.msra.mxu0 %v312_v2  ;;  %v309_v12 = vld [vmem:[%s4628_s11 + $0x38] sm:$0xff]  ;;  %s4447_s18 = smov 16   ;;  %vm3601_vm5 = vcmask 1041409   ;;  %vm3603_vm6 = vcmask 1042434   ;;  %s3732_s22 = sshll.u32 %s4624_s10, 3  ;;  %vm3605_vm7 = vcmask 1043459  }
  0x5b   : > { %3897 = vmatprep.subr.mxu0 %v311_v4  ;;  %vm3607_vm8 = vcmask 1044484   ;;  %vm3609_vm9 = vcmask 1045509   ;;  %vm3611_vm10 = vcmask 1046534   ;;  %s3801_s21 = sshll.u32 %s4509_s5, 7  ;;  %s300_s13 = scalar_lea.vmem [#allocation9], %s3732_s22  ;;  %vm3613_vm11 = vcmask 1047559  }
  0x5c   : > { %3898 = vmatpush3.msra.mxu0 %v311_v4  ;;  %s3631_s9 = sshll.u32 %s300_s13, 4  ;;  %p5182_p2 = scmp.ne.s32.totalorder %s5175_s27, 0  ;;  %s3632_s9 = int_to_ptr.vmem [resolvable:$true] %s3631_s9 }
  0x5d   : > { %3899 = vmatprep.subr.mxu0 %v310_v5  ;;  %s4449_s5 = smov [#allocation9]  }
  0x5e   : > { %3900 = vmatpush3.msra.mxu0 %v310_v5 }
  0x5f   : > { %3902 = vmatmul.mubr.msk.f32.vlgmr.msra.gmra.mxu0 %vm314_vm0, %v303_v6  ;;  %3913 = vmatprep.subr.mxu0 %v4440_v13 }
  0x60   : > { %3904 = vmatprep.mubr.msk.f32.mxu0 %vm314_vm0, %v304_v7 }
  0x63   : > { %3905 = vmatmul.mubr.msk.f32.gmra.mxu0 %vm314_vm0, %v305_v8 }
  0x64   : > { %3907 = vmatprep.mubr.msk.f32.mxu0 %vm314_vm0, %v306_v9 }
  0x67   : > { %3908 = vmatmul.mubr.msk.f32.gmra.mxu0 %vm314_vm0, %v307_v10 }
  0x68   : > { %3910 = vmatprep.mubr.msk.f32.mxu0 %vm314_vm0, %v308_v11 }
  0x6b   : > { %3911 = vmatmul.mubr.msk.f32.gmra.mxu0 %vm314_vm0, %v309_v12 }
  0x6c   : > { %3915 = vmatprep.mubr.msk.f32.mxu0 %vm4441_vm1, %v4440_v13 }
 0x11f   : > { %v4660_v14 = vpop.f32.mrf.mxu0 }
 0x120   : > { %523 = vrot.lane.b32.xlu1 %v4660_v14, %s4442_s28 }
 0x121   : > { %v4663_v15 = vpop.f32.mrf.mxu0 }
 0x122   : > { %445 = vrot.lane.b32.xlu0 %v4663_v15, %s4442_s28 }
 0x123   : > { %v4666_v16 = vpop.f32.mrf.mxu0 }
 0x124   : > { %677 = vrot.lane.b32.xlu1 %v4666_v16, %s4442_s28 }
 0x125   : > { %v4669_v17 = vpop.f32.mrf.mxu0 }
 0x126   : > { %600 = vrot.lane.b32.xlu0 %v4669_v17, %s4442_s28 }
 0x127   : > { %v4672_v18 = vpop.f32.mrf.mxu0 }
 0x128   : > { %831 = vrot.lane.b32.xlu1 %v4672_v18, %s4442_s28 }
 0x129   : > { %v4675_v19 = vpop.f32.mrf.mxu0 }
 0x12a   : > { %754 = vrot.lane.b32.xlu0 %v4675_v19, %s4442_s28 }
 0x12b   : > { %v4678_v20 = vpop.f32.mrf.mxu0 }
 0x12c   : > { %985 = vrot.lane.b32.xlu1 %v4678_v20, %s4442_s28 }
 0x12d   : > { %v4681_v21 = vpop.f32.mrf.mxu0 }
 0x12e   : > { %908 = vrot.lane.b32.xlu0 %v4681_v21, %s4442_s28 }
 0x130   : > { %1158 = vrot.lane.b32.xlu1 %v4663_v15, %s4443_s30 }
 0x192   : > { %v524_v22 = vpop.permute.xlu1 %523 }
 0x194   : > { %v446_v23 = vpop.permute.xlu0 %445 }
 0x195   : > { %3914 = vmatpush3.xpose.msk.msra.mxu0 %vm447_vm2, %v446_v23 }
 0x196   : > { %v678_v24 = vpop.permute.xlu1 %677  ;;  %3918 = vmatprep.subr.mxu0 %v4440_v13 }
 0x198   : > { %3916 = vmatmul.mubr.msk.f32.vlgmr.msra.gmra.mxu0 %vm447_vm2, %v4663_v15  ;;  %v601_v25 = vpop.permute.xlu0 %600 }
 0x199   : > { %3919 = vmatpush3.xpose.msk.msra.mxu0 %vm447_vm2, %v524_v22  ;;  %3924 = vmatpush3.xpose.msk.msra.mxu1 %vm447_vm2, %v601_v25 }
 0x19a   : > { %v832_v26 = vpop.permute.xlu1 %831  ;;  %3920 = vmatprep.mubr.msk.f32.mxu0 %vm4441_vm1, %v4440_v13  ;;  %3928 = vmatprep.subr.mxu1 %v4440_v13 }
 0x19b   : > { %3938 = vmatprep.subr.mxu0 %v4440_v13 }
 0x19c   : > { %3921 = vmatmul.mubr.msk.f32.vlgmr.msra.gmra.mxu0 %vm447_vm2, %v4660_v14  ;;  %3926 = vmatmul.mubr.msk.f32.vlgmr.msra.gmra.mxu1 %vm447_vm2, %v4669_v17  ;;  %v755_v27 = vpop.permute.xlu0 %754 }
 0x19d   : > { %3929 = vmatpush3.xpose.msk.msra.mxu1 %vm447_vm2, %v678_v24  ;;  %3939 = vmatpush3.xpose.msk.msra.mxu0 %vm447_vm2, %v832_v26 }
 0x19e   : > { %3930 = vmatprep.mubr.msk.f32.mxu1 %vm4441_vm1, %v4440_v13  ;;  %3940 = vmatprep.mubr.msk.f32.mxu0 %vm4441_vm1, %v4440_v13  ;;  %v986_v28 = vpop.permute.xlu1 %985 }
 0x19f   : > { %3933 = vmatprep.subr.mxu1 %v4440_v13  ;;  %3948 = vmatprep.subr.mxu0 %v4440_v13 }
 0x1a0   : > { %3931 = vmatmul.mubr.msk.f32.vlgmr.msra.gmra.mxu1 %vm447_vm2, %v4666_v16  ;;  %3941 = vmatmul.mubr.msk.f32.vlgmr.msra.gmra.mxu0 %vm447_vm2, %v4672_v18  ;;  %v909_v29 = vpop.permute.xlu0 %908 }
 0x1a1   : > { %3934 = vmatpush3.xpose.msk.msra.mxu1 %vm447_vm2, %v755_v27  ;;  %3949 = vmatpush3.xpose.msk.msra.mxu0 %vm447_vm2, %v986_v28 }
 0x1a2   : > { %3935 = vmatprep.mubr.msk.f32.mxu1 %vm4441_vm1, %v4440_v13  ;;  %3950 = vmatprep.mubr.msk.f32.mxu0 %vm4441_vm1, %v4440_v13  ;;  %v1159_v30 = vpop.permute.xlu1 %1158 }
 0x1a3   : > { %3943 = vmatprep.subr.mxu1 %v4440_v13  ;;  %3958 = vmatprep.subr.mxu0 %v4440_v13 }
 0x1a4   : > { %3936 = vmatmul.mubr.msk.f32.vlgmr.msra.gmra.mxu1 %vm447_vm2, %v4675_v19  ;;  %3951 = vmatmul.mubr.msk.f32.vlgmr.msra.gmra.mxu0 %vm447_vm2, %v4678_v20 }
 0x1a5   : > { %3944 = vmatpush3.xpose.msk.msra.mxu1 %vm447_vm2, %v909_v29  ;;  %3945 = vmatprep.mubr.msk.f32.mxu1 %vm4441_vm1, %v4440_v13 }
 0x1a6   : > { %3953 = vmatprep.subr.mxu1 %v4440_v13  ;;  %3960 = vmatprep.mubr.msk.f32.mxu0 %vm4441_vm1, %v4440_v13 }
 0x1a8   : > { %3946 = vmatmul.mubr.msk.f32.vlgmr.msra.gmra.mxu1 %vm447_vm2, %v4681_v21 }
 0x1a9   : > { %3954 = vmatpush3.msra.mxu1 %v1159_v30  ;;  %3955 = vmatprep.mubr.msk.f32.mxu1 %vm4441_vm1, %v4440_v13 }
 0x1aa   : > { %3963 = vmatprep.subr.mxu1 %v4440_v13 }
 0x258   : > { %v518_v31 = vpop.f32.mrf.mxu0 }
 0x259   : > { %v1061_v32 = vmul.f32 0.25, %v518_v31 }
 0x25a   : > { %v3917_v33 = vpop.f32.mrf.mxu0 }
 0x25b   : > { %v1070_v34 = vsel %vm1069_vm3, %v1061_v32, -inf }
 0x25c   : > { %v672_v35 = vpop.f32.mrf.mxu1  ;;  %1071 = vmax.xlane.f32.xlu0 %v1070_v34  ;;  %v595_v36 = vpop.f32.mrf.mxu0 }
 0x25d   : > { %v1063_v37 = vmul.f32 0.25, %v672_v35  ;;  %v1062_v38 = vmul.f32 0.25, %v595_v36 }
 0x25e   : > { %v3922_v39 = vpop.f32.mrf.mxu0  ;;  %v3927_v40 = vpop.f32.mrf.mxu1 }
 0x25f   : > { %v1076_v41 = vsel %vm1069_vm3, %v1063_v37, -inf  ;;  %v1073_v42 = vsel %vm1069_vm3, %v1062_v38, -inf }
 0x260   : > { %v749_v43 = vpop.f32.mrf.mxu1  ;;  %1077 = vmax.xlane.f32.xlu0 %v1076_v41  ;;  %1074 = vmax.xlane.f32.xlu1 %v1073_v42  ;;  %v903_v44 = vpop.f32.mrf.mxu0 }
 0x261   : > { %v1064_v45 = vmul.f32 0.25, %v749_v43  ;;  %v1066_v48 = vmul.f32 0.25, %v903_v44 }
 0x262   : > { %v3932_v46 = vpop.f32.mrf.mxu1  ;;  %v3942_v47 = vpop.f32.mrf.mxu0 }
 0x263   : > { %v1079_v49 = vsel %vm1069_vm3, %v1064_v45, -inf  ;;  %v1085_v57 = vsel %vm1069_vm3, %v1066_v48, -inf }
 0x264   : > { %v826_v50 = vpop.f32.mrf.mxu1  ;;  %1080 = vmax.xlane.f32.xlu0 %v1079_v49  ;;  %v1057_v51 = vpop.f32.mrf.mxu0 }
 0x265   : > { %v1065_v52 = vmul.f32 0.25, %v826_v50  ;;  %v1068_v55 = vmul.f32 0.25, %v1057_v51 }
 0x266   : > { %v3937_v53 = vpop.f32.mrf.mxu1  ;;  %v3952_v54 = vpop.f32.mrf.mxu0 }
 0x267   : > { %v1082_v56 = vsel %vm1069_vm3, %v1065_v52, -inf  ;;  %v1091_v60 = vsel %vm1069_vm3, %v1068_v55, -inf }
 0x268   : > { %v980_v58 = vpop.f32.mrf.mxu1  ;;  %1083 = vmax.xlane.f32.xlu1 %v1082_v56  ;;  %1086 = vmax.xlane.f32.xlu0 %v1085_v57 }
 0x269   : > { %v4756_v61 = vmul.f32 0.25, %v980_v58 }
 0x26a   : > { %v3947_v59 = vpop.f32.mrf.mxu1 }
 0x26b   : > { %v1088_v62 = vsel %vm1069_vm3, %v4756_v61, -inf }
 0x26c   : > { %1092 = vmax.xlane.f32.xlu0 %v1091_v60 }
 0x279   : > { %1310 = vrot.lane.b32.xlu1 %v4669_v17, %s4443_s30 }
 0x282   : > { %1234 = vrot.lane.b32.xlu0 %v4660_v14, %s4443_s30 }
 0x286   : > { %1462 = vrot.lane.b32.xlu0 %v4675_v19, %s4443_s30 }
 0x28a   : > { %1614 = vrot.lane.b32.xlu0 %v4681_v21, %s4443_s30 }
 0x28e   : > { %1768 = vrot.lane.b32.xlu0 %v4663_v15, %s4444_s14 }
 0x292   : > { %1766 = vrot.lane.b32.xlu0 %v4663_v15, %s4445_s15 }
 0x296   : > { %1924 = vrot.lane.b32.xlu0 %v4669_v17, %s4444_s14 }
 0x29a   : > { %1922 = vrot.lane.b32.xlu0 %v4669_v17, %s4445_s15 }
 0x29d   : > { %1089 = vmax.xlane.f32.xlu1 %v1088_v62 }
 0x2ae   : > { %1386 = vrot.lane.b32.xlu1 %v4666_v16, %s4443_s30 }
 0x2b2   : > { %1538 = vrot.lane.b32.xlu1 %v4672_v18, %s4443_s30 }
 0x2b6   : > { %1690 = vrot.lane.b32.xlu1 %v4678_v20, %s4443_s30  ;;  %s5121_s30 = scalar_lea.hbm %s5165_s6, %s3801_s21 }
 0x2ba   : > { %1846 = vrot.lane.b32.xlu1 %v4660_v14, %s4444_s14 }
 0x2be   : > { %1844 = vrot.lane.b32.xlu1 %v4660_v14, %s4445_s15 }
 0x2c2   : > { %2002 = vrot.lane.b32.xlu1 %v4666_v16, %s4444_s14 }
 0x2c6   : > { %2000 = vrot.lane.b32.xlu1 %v4666_v16, %s4445_s15 }
 0x2e5   : > { %v1072_v63 = vpop.xlane.xlu0 %1071 }
 0x2e6   : > { %v1094_v0 = vsub.f32 %v1061_v32, %v1072_v63 }
 0x2e8   : > { %v1102_v1 = vmul.f32 1.442695, %v1094_v0 }
 0x2e9   : > { %v1078_v2 = vpop.xlane.xlu0 %1077  ;;  %v1075_v3 = vpop.xlane.xlu1 %1074 }
 0x2ea   : > { %4173 = vpow2.f32 %v1102_v1  ;;  %v1096_v4 = vsub.f32 %v1063_v37, %v1078_v2  ;;  %v1095_v5 = vsub.f32 %v1062_v38, %v1075_v3 }
 0x2ec   : > { %v1106_v6 = vmul.f32 1.442695, %v1096_v4  ;;  %v1104_v7 = vmul.f32 1.442695, %v1095_v5 }
 0x2ed   : > { %v1081_v8 = vpop.xlane.xlu0 %1080 }
 0x2ee   : > { %4175 = vpow2.f32 %v1106_v6  ;;  %v1097_v9 = vsub.f32 %v1064_v45, %v1081_v8 }
 0x2ef   : > { %4177 = vpow2.f32 %v1104_v7 }
 0x2f0   : > { %v1108_v10 = vmul.f32 1.442695, %v1097_v9 }
 0x2f1   : > { %v1084_v11 = vpop.xlane.xlu1 %1083  ;;  %v1087_v12 = vpop.xlane.xlu0 %1086 }
 0x2f2   : > { %4179 = vpow2.f32 %v1108_v10  ;;  %v1098_v22 = vsub.f32 %v1065_v52, %v1084_v11  ;;  %v1099_v23 = vsub.f32 %v1066_v48, %v1087_v12 }
 0x2f4   : > { %v1110_v24 = vmul.f32 1.442695, %v1098_v22  ;;  %v1112_v25 = vmul.f32 1.442695, %v1099_v23 }
 0x2f5   : > { %v1093_v26 = vpop.xlane.xlu0 %1092  ;;  %v1311_v44 = vpop.permute.xlu1 %1310 }
 0x2f6   : > { %4181 = vpow2.f32 %v1110_v24  ;;  %v1101_v27 = vsub.f32 %v1068_v55, %v1093_v26 }
 0x2f7   : > { %v4776_v28 = vpop.eup %4173  ;;  %4183 = vpow2.f32 %v1112_v25 }
 0x2f8   : > { %v1116_v29 = vmul.f32 1.442695, %v1101_v27  ;;  %v1118_v30 = vsel %vm1069_vm3, %v4776_v28, 0.0 }
 0x2f9   : > { %1119 = vadd.xlane.f32.xlu1 %v1118_v30  ;;  %v1235_v31 = vpop.permute.xlu0 %1234 }
 0x2fa   : > { %4185 = vpow2.f32 %v1116_v29  ;;  %3959 = vmatpush3.msra.mxu0 %v1235_v31 }
 0x2fb   : > { %v4780_v32 = vpop.eup %4175  ;;  %3968 = vmatprep.subr.mxu0 %v4440_v13 }
 0x2fc   : > { %v4783_v33 = vpop.eup %4177  ;;  %v1124_v34 = vsel %vm1069_vm3, %v4780_v32, 0.0 }
 0x2fd   : > { %1125 = vadd.xlane.f32.xlu1 %v1124_v34  ;;  %v1121_v35 = vsel %vm1069_vm3, %v4783_v33, 0.0  ;;  %v1463_v52 = vpop.permute.xlu0 %1462 }
 0x2fe   : > { %1122 = vadd.xlane.f32.xlu0 %v1121_v35 }
 0x2ff   : > { %v4789_v36 = vpop.eup %4179 }
 0x300   : > { %v1127_v37 = vsel %vm1069_vm3, %v4789_v36, 0.0 }
 0x301   : > { %v1615_v54 = vpop.permute.xlu0 %1614 }
 0x302   : > { %1128 = vadd.xlane.f32.xlu0 %v1127_v37 }
 0x303   : > { %v4793_v38 = vpop.eup %4181 }
 0x304   : > { %v4795_v39 = vpop.eup %4183  ;;  %v1130_v40 = vsel %vm1069_vm3, %v4793_v38, 0.0 }
 0x305   : > { %1131 = vadd.xlane.f32.xlu1 %v1130_v40  ;;  %v1133_v41 = vsel %vm1069_vm3, %v4795_v39, 0.0  ;;  %v4826_v56 = vpop.permute.xlu0 %1768 }
 0x306   : > { %1134 = vadd.xlane.f32.xlu0 %v1133_v41 }
 0x307   : > { %v4801_v42 = vpop.eup %4185 }
 0x308   : > { %v1139_v43 = vsel %vm1069_vm3, %v4801_v42, 0.0 }
 0x309   : > { %v4828_v58 = vpop.permute.xlu0 %1766 }
 0x30a   : > { %1140 = vadd.xlane.f32.xlu0 %v1139_v43 }
 0x30d   : > { %v4830_v60 = vpop.permute.xlu0 %1924 }
 0x311   : > { %v4832_v63 = vpop.permute.xlu0 %1922 }
 0x320   : > { %2080 = vrot.lane.b32.xlu0 %v4675_v19, %s4444_s14 }
 0x324   : > { %2078 = vrot.lane.b32.xlu0 %v4675_v19, %s4445_s15 }
 0x326   : > { %v1090_v45 = vpop.xlane.xlu1 %1089 }
 0x327   : > { %v1100_v46 = vsub.f32 %v4756_v61, %v1090_v45 }
 0x328   : > { %2236 = vrot.lane.b32.xlu0 %v4681_v21, %s4444_s14 }
 0x329   : > { %v1114_v47 = vmul.f32 1.442695, %v1100_v46 }
 0x32a   : > { %v1387_v50 = vpop.permute.xlu1 %1386 }
 0x32b   : > { %4187 = vpow2.f32 %v1114_v47 }
 0x32c   : > { %2234 = vrot.lane.b32.xlu0 %v4681_v21, %s4445_s15 }
 0x32e   : > { %v1539_v51 = vpop.permute.xlu1 %1538 }
 0x332   : > { %v1691_v53 = vpop.permute.xlu1 %1690 }
 0x336   : > { %v1847_v55 = vpop.permute.xlu1 %1846 }
 0x338   : > { %v4814_v48 = vpop.eup %4187 }
 0x339   : > { %v1136_v49 = vsel %vm1069_vm3, %v4814_v48, 0.0 }
 0x33a   : > { %1137 = vadd.xlane.f32.xlu1 %v1136_v49  ;;  %v1845_v57 = vpop.permute.xlu1 %1844 }
 0x33e   : > { %v2003_v59 = vpop.permute.xlu1 %2002 }
 0x342   : > { %v2001_v61 = vpop.permute.xlu1 %2000 }
 0x34b   : > { %2158 = vrot.lane.b32.xlu1 %v4672_v18, %s4444_s14 }
 0x34f   : > { %2156 = vrot.lane.b32.xlu1 %v4672_v18, %s4445_s15 }
 0x353   : > { %2314 = vrot.lane.b32.xlu1 %v4678_v20, %s4444_s14  ;;  %s3618_s14 = scalar_lea.sflag [#allocation5], %s4624_s10 }
 0x357   : > { %2312 = vrot.lane.b32.xlu1 %v4678_v20, %s4445_s15  ;;  %s4365_s15 = scalar_lea.vmem %s3632_s9, 128 }
 0x358   : > { %p4366_p5 = scmp.ne.s32.totalorder %s3632_s9, %s4365_s15 }
 0x35a   : > { %p4367_p7 = pnand %p4366_p5, %p5182_p2 }
 0x35c   : > { %p4368_p12 = pneg %p4367_p7 }
 0x382   : > { %v1120_v62 = vpop.xlane.xlu1 %1119 }
 0x383   : > { %4189 = vrcp.f32 %v1120_v62 }
 0x386   : > { %v1126_v0 = vpop.xlane.xlu1 %1125 }
 0x387   : > { %4191 = vrcp.f32 %v1126_v0  ;;  %v1123_v1 = vpop.xlane.xlu0 %1122 }
 0x388   : > { %4193 = vrcp.f32 %v1123_v1 }
 0x38b   : > { %v1129_v2 = vpop.xlane.xlu0 %1128 }
 0x38c   : > { %4195 = vrcp.f32 %v1129_v2 }
 0x38e   : > { %v1132_v3 = vpop.xlane.xlu1 %1131 }
 0x38f   : > { %4197 = vrcp.f32 %v1132_v3  ;;  %v1135_v4 = vpop.xlane.xlu0 %1134 }
 0x390   : > { %v4190_v5 = vpop.eup %4189  ;;  %4199 = vrcp.f32 %v1135_v4 }
 0x391   : > { %v1143_v6 = vmul.f32 %v4190_v5, %v4776_v28 }
 0x393   : > { %v1141_v7 = vpop.xlane.xlu0 %1140  ;;  %3956 = vmatmul.mubr.msk.f32.vlgmr.msra.gmra.mxu1 %vm1069_vm3, %v1143_v6 }
 0x394   : > { %v4192_v8 = vpop.eup %4191  ;;  %4201 = vrcp.f32 %v1141_v7  ;;  %3964 = vmatpush3.msra.mxu1 %v1311_v44  ;;  %3965 = vmatprep.mubr.msk.f32.mxu1 %vm4441_vm1, %v4440_v13 }
 0x395   : > { %v4194_v9 = vpop.eup %4193  ;;  %3973 = vmatprep.subr.mxu1 %v4440_v13  ;;  %v1147_v10 = vmul.f32 %v4192_v8, %v4780_v32 }
 0x396   : > { %v1145_v11 = vmul.f32 %v4194_v9, %v4783_v33 }
 0x397   : > { %3966 = vmatmul.mubr.msk.f32.vlgmr.msra.gmra.mxu1 %vm1069_vm3, %v1147_v10  ;;  %v2081_v34 = vpop.permute.xlu0 %2080 }
 0x398   : > { %3961 = vmatmul.mubr.msk.f32.vlgmr.msra.gmra.mxu0 %vm1069_vm3, %v1145_v11  ;;  %3974 = vmatpush3.msra.mxu1 %v1463_v52 }
 0x399   : > { %v4196_v12 = vpop.eup %4195  ;;  %3969 = vmatpush3.msra.mxu0 %v1387_v50  ;;  %3970 = vmatprep.mubr.msk.f32.mxu0 %vm4441_vm1, %v4440_v13 }
 0x39a   : > { %3978 = vmatprep.subr.mxu0 %v4440_v13  ;;  %v1149_v22 = vmul.f32 %v4196_v12, %v4789_v36  ;;  %3975 = vmatprep.mubr.msk.f32.mxu1 %vm4441_vm1, %v4440_v13 }
 0x39b   : > { %3983 = vmatprep.subr.mxu1 %v4440_v13  ;;  %v2079_v37 = vpop.permute.xlu0 %2078 }
 0x39c   : > { %v4198_v23 = vpop.eup %4197  ;;  %3971 = vmatmul.mubr.msk.f32.vlgmr.msra.gmra.mxu0 %vm1069_vm3, %v1149_v22 }
 0x39d   : > { %v4200_v24 = vpop.eup %4199  ;;  %3979 = vmatpush3.msra.mxu0 %v1539_v51  ;;  %3980 = vmatprep.mubr.msk.f32.mxu0 %vm4441_vm1, %v4440_v13  ;;  %v1151_v25 = vmul.f32 %v4198_v23, %v4793_v38 }
 0x39e   : > { %3988 = vmatprep.subr.mxu0 %v4440_v13  ;;  %v1153_v26 = vmul.f32 %v4200_v24, %v4795_v39 }
 0x39f   : > { %3976 = vmatmul.mubr.msk.f32.vlgmr.msra.gmra.mxu1 %vm1069_vm3, %v1151_v25  ;;  %v2237_v38 = vpop.permute.xlu0 %2236 }
 0x3a0   : > { %3981 = vmatmul.mubr.msk.f32.vlgmr.msra.gmra.mxu0 %vm1069_vm3, %v1153_v26  ;;  %3984 = vmatpush3.msra.mxu1 %v1615_v54 }
 0x3a1   : > { %v4202_v27 = vpop.eup %4201  ;;  %3989 = vmatpush3.msra.mxu0 %v1691_v53  ;;  %3990 = vmatprep.mubr.msk.f32.mxu0 %vm4441_vm1, %v4440_v13 }
 0x3a2   : > { %3998 = vmatprep.subr.mxu0 %v4440_v13  ;;  %v1157_v28 = vmul.f32 %v4202_v27, %v4801_v42  ;;  %3985 = vmatprep.mubr.msk.f32.mxu1 %vm4441_vm1, %v4440_v13 }
 0x3a3   : > { %3993 = vmatprep.subr.mxu1 %v4440_v13  ;;  %v2235_v39 = vpop.permute.xlu0 %2234 }
 0x3a4   : > { %3991 = vmatmul.mubr.msk.f32.vlgmr.msra.gmra.mxu0 %vm1069_vm3, %v1157_v28 }
 0x3a5   : > { %3999 = vmatpush3.xpose.msk.msra.mxu0 %vm447_vm2, %v1847_v55  ;;  %4000 = vmatprep.mubr.msk.f32.mxu0 %vm4441_vm1, %v4440_v13 }
 0x3a6   : > { %4008 = vmatprep.subr.mxu0 %v4440_v13 }
 0x3a8   : > { %4001 = vmatmul.mubr.msk.f32.vlgmr.msra.gmra.mxu0 %vm447_vm2, %v1845_v57 }
 0x3a9   : > { %4009 = vmatpush3.xpose.msk.msra.mxu0 %vm447_vm2, %v2003_v59  ;;  %4010 = vmatprep.mubr.msk.f32.mxu0 %vm4441_vm1, %v4440_v13 }
 0x3aa   : > { %4018 = vmatprep.subr.mxu0 %v4440_v13 }
 0x3ac   : > { %4011 = vmatmul.mubr.msk.f32.vlgmr.msra.gmra.mxu0 %vm447_vm2, %v2001_v61 }
 0x3ad   : > { %4020 = vmatprep.mubr.msk.f32.mxu0 %vm4441_vm1, %v4440_v13 }
 0x3c3   : > { %v1138_v29 = vpop.xlane.xlu1 %1137 }
 0x3c4   : > { %4203 = vrcp.f32 %v1138_v29 }
 0x3c7   : > { %v2159_v30 = vpop.permute.xlu1 %2158 }
 0x3c8   : > { %4019 = vmatpush3.xpose.msk.msra.mxu0 %vm447_vm2, %v2159_v30 }
 0x3c9   : > { %4028 = vmatprep.subr.mxu0 %v4440_v13 }
 0x3cb   : > { %v2157_v31 = vpop.permute.xlu1 %2156 }
 0x3cc   : > { %4021 = vmatmul.mubr.msk.f32.vlgmr.msra.gmra.mxu0 %vm447_vm2, %v2157_v31 }
 0x3cd   : > { %4030 = vmatprep.mubr.msk.f32.mxu0 %vm4441_vm1, %v4440_v13 }
 0x3cf   : > { %v2315_v32 = vpop.permute.xlu1 %2314 }
 0x3d0   : > { %4029 = vmatpush3.xpose.msk.msra.mxu0 %vm447_vm2, %v2315_v32 }
 0x3d1   : > { %v4204_v33 = vpop.eup %4203  ;;  %4038 = vmatprep.subr.mxu0 %v4440_v13 }
 0x3d2   : > { %v1155_v35 = vmul.f32 %v4204_v33, %v4814_v48 }
 0x3d3   : > { %v2313_v36 = vpop.permute.xlu1 %2312 }
 0x3d4   : > { %3986 = vmatmul.mubr.msk.f32.vlgmr.msra.gmra.mxu1 %vm1069_vm3, %v1155_v35  ;;  %4031 = vmatmul.mubr.msk.f32.vlgmr.msra.gmra.mxu0 %vm447_vm2, %v2313_v36 }
 0x3d5   : > { %3994 = vmatpush3.xpose.msk.msra.mxu1 %vm447_vm2, %v4826_v56  ;;  %3995 = vmatprep.mubr.msk.f32.mxu1 %vm4441_vm1, %v4440_v13 }
 0x3d6   : > { %4003 = vmatprep.subr.mxu1 %v4440_v13  ;;  %4040 = vmatprep.mubr.msk.f32.mxu0 %vm4441_vm1, %v4440_v13 }
 0x3d8   : > { %3996 = vmatmul.mubr.msk.f32.vlgmr.msra.gmra.mxu1 %vm447_vm2, %v4828_v58 }
 0x3d9   : > { %4004 = vmatpush3.xpose.msk.msra.mxu1 %vm447_vm2, %v4830_v60  ;;  %4005 = vmatprep.mubr.msk.f32.mxu1 %vm4441_vm1, %v4440_v13 }
 0x3da   : > { %4013 = vmatprep.subr.mxu1 %v4440_v13 }
 0x3dc   : > { %4006 = vmatmul.mubr.msk.f32.vlgmr.msra.gmra.mxu1 %vm447_vm2, %v4832_v63 }
 0x3dd   : > { %4014 = vmatpush3.xpose.msk.msra.mxu1 %vm447_vm2, %v2081_v34  ;;  %4015 = vmatprep.mubr.msk.f32.mxu1 %vm4441_vm1, %v4440_v13 }
 0x3de   : > { %4023 = vmatprep.subr.mxu1 %v4440_v13 }
 0x3e0   : > { %4016 = vmatmul.mubr.msk.f32.vlgmr.msra.gmra.mxu1 %vm447_vm2, %v2079_v37 }
 0x3e1   : > { %4024 = vmatpush3.xpose.msk.msra.mxu1 %vm447_vm2, %v2237_v38  ;;  %4025 = vmatprep.mubr.msk.f32.mxu1 %vm4441_vm1, %v4440_v13 }
 0x3e2   : > { %4033 = vmatprep.subr.mxu1 %v4440_v13 }
 0x3e4   : > { %4026 = vmatmul.mubr.msk.f32.vlgmr.msra.gmra.mxu1 %vm447_vm2, %v2235_v39 }
 0x3e5   : > { %4035 = vmatprep.mubr.msk.f32.mxu1 %vm4441_vm1, %v4440_v13 }
 0x453   : > { %v4916_v40 = vpop.f32.mrf.mxu1 }
 0x455   : > { %v3957_v41 = vpop.f32.mrf.mxu1 }
 0x457   : > { %v4918_v42 = vpop.f32.mrf.mxu1 }
 0x458   : > { %v4920_v43 = vpop.f32.mrf.mxu0 }
 0x459   : > { %v3967_v44 = vpop.f32.mrf.mxu1 }
 0x45a   : > { %v3962_v45 = vpop.f32.mrf.mxu0 }
 0x45c   : > { %v4922_v46 = vpop.f32.mrf.mxu0 }
 0x45e   : > { %v3972_v47 = vpop.f32.mrf.mxu0 }
 0x45f   : > { %v4924_v48 = vpop.f32.mrf.mxu1 }
 0x460   : > { %v4926_v49 = vpop.f32.mrf.mxu0 }
 0x461   : > { %v3977_v50 = vpop.f32.mrf.mxu1 }
 0x462   : > { %v3982_v51 = vpop.f32.mrf.mxu0 }
 0x464   : > { %v4928_v52 = vpop.f32.mrf.mxu0 }
 0x466   : > { %v3992_v53 = vpop.f32.mrf.mxu0 }
 0x468   : > { %v1918_v54 = vpop.f32.mrf.mxu0 }
 0x469   : > { %v2391_v55 = vmul.f32 0.25, %v1918_v54 }
 0x46a   : > { %v4002_v56 = vpop.f32.mrf.mxu0 }
 0x46b   : > { %v2401_v57 = vsel %vm1069_vm3, %v2391_v55, -inf }
 0x46c   : > { %2402 = vmax.xlane.f32.xlu1 %v2401_v57  ;;  %v2074_v58 = vpop.f32.mrf.mxu0 }
 0x46d   : > { %v2393_v9 = vmul.f32 0.25, %v2074_v58 }
 0x46e   : > { %v4012_v59 = vpop.f32.mrf.mxu0 }
 0x46f   : > { %v2407_v25 = vsel %vm1069_vm3, %v2393_v9, -inf }
 0x48c   : > { %v2230_v60 = vpop.f32.mrf.mxu0 }
 0x48d   : > { %v2395_v23 = vmul.f32 0.25, %v2230_v60 }
 0x48e   : > { %v4022_v61 = vpop.f32.mrf.mxu0 }
 0x48f   : > { %v2413_v31 = vsel %vm1069_vm3, %v2395_v23, -inf }
 0x494   : > { %v4931_v62 = vpop.f32.mrf.mxu1  ;;  %v2386_v63 = vpop.f32.mrf.mxu0 }
 0x495   : > { %v2397_v29 = vmul.f32 0.25, %v2386_v63 }
 0x496   : > { %v3987_v0 = vpop.f32.mrf.mxu1  ;;  %v4032_v1 = vpop.f32.mrf.mxu0 }
 0x497   : > { %v2419_v32 = vsel %vm1069_vm3, %v2397_v29, -inf }
 0x498   : > { %v1840_v2 = vpop.f32.mrf.mxu1 }
 0x499   : > { %v2390_v3 = vmul.f32 0.25, %v1840_v2 }
 0x49a   : > { %v3997_v4 = vpop.f32.mrf.mxu1 }
 0x49b   : > { %v2398_v5 = vsel %vm1069_vm3, %v2390_v3, -inf }
 0x49c   : > { %2399 = vmax.xlane.f32.xlu0 %v2398_v5  ;;  %v1996_v6 = vpop.f32.mrf.mxu1 }
 0x49d   : > { %v2392_v7 = vmul.f32 0.25, %v1996_v6 }
 0x49e   : > { %v4007_v8 = vpop.f32.mrf.mxu1 }
 0x49f   : > { %v2404_v10 = vsel %vm1069_vm3, %v2392_v7, -inf }
 0x4a0   : > { %2405 = vmax.xlane.f32.xlu0 %v2404_v10  ;;  %v2152_v11 = vpop.f32.mrf.mxu1 }
 0x4a1   : > { %v2394_v12 = vmul.f32 0.25, %v2152_v11 }
 0x4a2   : > { %v4017_v22 = vpop.f32.mrf.mxu1 }
 0x4a3   : > { %v2410_v24 = vsel %vm1069_vm3, %v2394_v12, -inf }
 0x4a4   : > { %v2308_v26 = vpop.f32.mrf.mxu1  ;;  %2411 = vmax.xlane.f32.xlu1 %v2410_v24  ;;  %2408 = vmax.xlane.f32.xlu0 %v2407_v25 }
 0x4a5   : > { %v2396_v27 = vmul.f32 0.25, %v2308_v26 }
 0x4a6   : > { %v4027_v28 = vpop.f32.mrf.mxu1 }
 0x4a7   : > { %v2416_v30 = vsel %vm1069_vm3, %v2396_v27, -inf }
 0x4a8   : > { %2417 = vmax.xlane.f32.xlu1 %v2416_v30  ;;  %2414 = vmax.xlane.f32.xlu0 %v2413_v31 }
 0x4ac   : > { %2420 = vmax.xlane.f32.xlu0 %v2419_v32 }
 0x4b9   : > { %2486 = vrot.lane.b32.xlu1 %v4663_v15, %s4446_s17 }
 0x4bd   : > { %2638 = vrot.lane.b32.xlu1 %v4669_v17, %s4446_s17 }
 0x4c1   : > { %2714 = vrot.lane.b32.xlu1 %v4666_v16, %s4446_s17 }
 0x4c2   : > { %2562 = vrot.lane.b32.xlu0 %v4660_v14, %s4446_s17 }
 0x4c5   : > { %2866 = vrot.lane.b32.xlu1 %v4672_v18, %s4446_s17 }
 0x4c6   : > { %2790 = vrot.lane.b32.xlu0 %v4675_v19, %s4446_s17 }
 0x4f5   : > { %v2403_v33 = vpop.xlane.xlu1 %2402 }
 0x4f6   : > { %v2423_v34 = vsub.f32 %v2391_v55, %v2403_v33 }
 0x4f8   : > { %v2432_v35 = vmul.f32 1.442695, %v2423_v34 }
 0x4fa   : > { %4205 = vpow2.f32 %v2432_v35 }
 0x507   : > { %v4952_v15 = vpop.eup %4205 }
 0x508   : > { %v2449_v17 = vsel %vm1069_vm3, %v4952_v15, 0.0 }
 0x509   : > { %2450 = vadd.xlane.f32.xlu0 %v2449_v17 }
 0x525   : > { %v2400_v16 = vpop.xlane.xlu0 %2399 }
 0x526   : > { %v2422_v36 = vsub.f32 %v2390_v3, %v2400_v16 }
 0x528   : > { %v2430_v37 = vmul.f32 1.442695, %v2422_v36 }
 0x529   : > { %v2406_v14 = vpop.xlane.xlu0 %2405 }
 0x52a   : > { %4207 = vpow2.f32 %v2430_v37  ;;  %v2424_v38 = vsub.f32 %v2392_v7, %v2406_v14 }
 0x52c   : > { %v2434_v18 = vmul.f32 1.442695, %v2424_v38 }
 0x52d   : > { %v2412_v39 = vpop.xlane.xlu1 %2411  ;;  %v2409_v41 = vpop.xlane.xlu0 %2408 }
 0x52e   : > { %4209 = vpow2.f32 %v2434_v18  ;;  %v2426_v19 = vsub.f32 %v2394_v12, %v2412_v39  ;;  %v2425_v44 = vsub.f32 %v2393_v9, %v2409_v41 }
 0x530   : > { %v2438_v45 = vmul.f32 1.442695, %v2426_v19  ;;  %v2436_v47 = vmul.f32 1.442695, %v2425_v44 }
 0x531   : > { %v2418_v50 = vpop.xlane.xlu1 %2417  ;;  %v2415_v51 = vpop.xlane.xlu0 %2414 }
 0x532   : > { %4211 = vpow2.f32 %v2438_v45  ;;  %v2428_v53 = vsub.f32 %v2396_v27, %v2418_v50  ;;  %v2427_v54 = vsub.f32 %v2395_v23, %v2415_v51  ;;  %v3137_v50 = vld [vmem:[#allocation8 + $0x18] sm:$0xff]  ;;  %v3136_v51 = vld [vmem:[#allocation8 + $0x10] sm:$0xff] }
 0x533   : > { %4213 = vpow2.f32 %v2436_v47 }
 0x534   : > { %v2442_v55 = vmul.f32 1.442695, %v2428_v53  ;;  %v2440_v56 = vmul.f32 1.442695, %v2427_v54  ;;  %v3135_v53 = vld [vmem:[#allocation8 + $0x8] sm:$0xff] }
 0x535   : > { %v2487_v57 = vpop.permute.xlu1 %2486  ;;  %v2421_v58 = vpop.xlane.xlu0 %2420 }
 0x536   : > { %4215 = vpow2.f32 %v2442_v55  ;;  %v2429_v59 = vsub.f32 %v2397_v29, %v2421_v58  ;;  %4034 = vmatpush3.msra.mxu1 %v2487_v57 }
 0x537   : > { %v4208_v60 = vpop.eup %4207  ;;  %4217 = vpow2.f32 %v2440_v56  ;;  %4043 = vmatprep.subr.mxu1 %v4440_v13  ;;  %v3134_v56 = vld [vmem:[#allocation8] sm:$0xff] }
 0x538   : > { %v2444_v61 = vmul.f32 1.442695, %v2429_v59  ;;  %v2446_v63 = vsel %vm1069_vm3, %v4208_v60, 0.0 }
 0x539   : > { %2447 = vadd.xlane.f32.xlu1 %v2446_v63  ;;  %v2563_v0 = vpop.permute.xlu0 %2562  ;;  %v2639_v24 = vpop.permute.xlu1 %2638 }
 0x53a   : > { %4219 = vpow2.f32 %v2444_v61  ;;  %4039 = vmatpush3.msra.mxu0 %v2563_v0 }
 0x53b   : > { %v4210_v1 = vpop.eup %4209  ;;  %4048 = vmatprep.subr.mxu0 %v4440_v13 }
 0x53c   : > { %v2452_v2 = vsel %vm1069_vm3, %v4210_v1, 0.0 }
 0x53d   : > { %2453 = vadd.xlane.f32.xlu1 %v2452_v2  ;;  %v2791_v22 = vpop.permute.xlu0 %2790  ;;  %v2715_v27 = vpop.permute.xlu1 %2714 }
 0x53f   : > { %v4212_v3 = vpop.eup %4211 }
 0x540   : > { %v4214_v4 = vpop.eup %4213  ;;  %v2458_v5 = vsel %vm1069_vm3, %v4212_v3, 0.0 }
 0x541   : > { %2459 = vadd.xlane.f32.xlu1 %v2458_v5  ;;  %v2455_v6 = vsel %vm1069_vm3, %v4214_v4, 0.0 }
 0x542   : > { %2456 = vadd.xlane.f32.xlu0 %v2455_v6 }
 0x543   : > { %v4216_v7 = vpop.eup %4215 }
 0x544   : > { %v4962_v8 = vpop.eup %4217  ;;  %v2464_v9 = vsel %vm1069_vm3, %v4216_v7, 0.0 }
 0x545   : > { %2465 = vadd.xlane.f32.xlu1 %v2464_v9  ;;  %v2461_v10 = vsel %vm1069_vm3, %v4962_v8, 0.0 }
 0x546   : > { %2462 = vadd.xlane.f32.xlu0 %v2461_v10 }
 0x547   : > { %v4967_v11 = vpop.eup %4219 }
 0x548   : > { %v2467_v12 = vsel %vm1069_vm3, %v4967_v11, 0.0 }
 0x54a   : > { %2468 = vadd.xlane.f32.xlu0 %v2467_v12 }
 0x556   : > { %3018 = vrot.lane.b32.xlu1 %v4678_v20, %s4446_s17  ;;  %v2867_v20 = vpop.permute.xlu1 %2866 }
 0x560   : > { %2942 = vrot.lane.b32.xlu0 %v4681_v21, %s4446_s17  ;;  %s4369_s17 = sshll.u32 %s4449_s5, 4  ;;  %s4370_s17 = int_to_ptr.vmem [resolvable:$false] %s4369_s17 }
 0x561   : > { %p4372_p13 = scmp.lt.s32.totalorder %s3632_s9, %s4370_s17 }
 0x592   : > { %v2451_v23 = vpop.xlane.xlu0 %2450 }
 0x593   : > { %4221 = vrcp.f32 %v2451_v23 }
 0x5a0   : > { %v4222_v25 = vpop.eup %4221 }
 0x5a1   : > { %v2473_v26 = vmul.f32 %v4222_v25, %v4952_v15 }
 0x5a3   : > { %4041 = vmatmul.mubr.msk.f32.vlgmr.msra.gmra.mxu0 %vm1069_vm3, %v2473_v26 }
 0x5a4   : > { %4049 = vmatpush3.msra.mxu0 %v2715_v27  ;;  %4050 = vmatprep.mubr.msk.f32.mxu0 %vm4441_vm1, %v4440_v13 }
 0x5a5   : > { %4058 = vmatprep.subr.mxu0 %v4440_v13 }
 0x5c2   : > { %v2448_v28 = vpop.xlane.xlu1 %2447 }
 0x5c3   : > { %4223 = vrcp.f32 %v2448_v28 }
 0x5c6   : > { %v2454_v21 = vpop.xlane.xlu1 %2453 }
 0x5c7   : > { %4225 = vrcp.f32 %v2454_v21 }
 0x5ca   : > { %v2460_v29 = vpop.xlane.xlu1 %2459 }
 0x5cb   : > { %4227 = vrcp.f32 %v2460_v29  ;;  %v2457_v30 = vpop.xlane.xlu0 %2456 }
 0x5cc   : > { %4229 = vrcp.f32 %v2457_v30 }
 0x5ce   : > { %v2466_v31 = vpop.xlane.xlu1 %2465 }
 0x5cf   : > { %4231 = vrcp.f32 %v2466_v31  ;;  %v2463_v32 = vpop.xlane.xlu0 %2462 }
 0x5d0   : > { %v4224_v33 = vpop.eup %4223  ;;  %4233 = vrcp.f32 %v2463_v32 }
 0x5d1   : > { %v2471_v34 = vmul.f32 %v4224_v33, %v4208_v60 }
 0x5d2   : > { %v3019_v44 = vpop.permute.xlu1 %3018 }
 0x5d3   : > { %v2469_v35 = vpop.xlane.xlu0 %2468  ;;  %4036 = vmatmul.mubr.msk.f32.vlgmr.msra.gmra.mxu1 %vm1069_vm3, %v2471_v34  ;;  %v3798_v34 = vld [vmem:[%s5163_s4] ss:$0 sm:$0xff] }
 0x5d4   : > { %v4226_v15 = vpop.eup %4225  ;;  %4235 = vrcp.f32 %v2469_v35  ;;  %4044 = vmatpush3.msra.mxu1 %v2639_v24  ;;  %4045 = vmatprep.mubr.msk.f32.mxu1 %vm4441_vm1, %v4440_v13 }
 0x5d5   : > { %4053 = vmatprep.subr.mxu1 %v4440_v13  ;;  %v2475_v17 = vmul.f32 %v4226_v15, %v4210_v1 }
 0x5d7   : > { %4046 = vmatmul.mubr.msk.f32.vlgmr.msra.gmra.mxu1 %vm1069_vm3, %v2475_v17  ;;  %v2943_v38 = vpop.permute.xlu0 %2942 }
 0x5d8   : > { %v4228_v16 = vpop.eup %4227  ;;  %4054 = vmatpush3.msra.mxu1 %v2791_v22  ;;  %4055 = vmatprep.mubr.msk.f32.mxu1 %vm4441_vm1, %v4440_v13 }
 0x5d9   : > { %v4230_v36 = vpop.eup %4229  ;;  %4063 = vmatprep.subr.mxu1 %v4440_v13  ;;  %v2479_v37 = vmul.f32 %v4228_v16, %v4212_v3 }
 0x5da   : > { %v2477_v14 = vmul.f32 %v4230_v36, %v4214_v4 }
 0x5db   : > { %4056 = vmatmul.mubr.msk.f32.vlgmr.msra.gmra.mxu1 %vm1069_vm3, %v2479_v37 }
 0x5dc   : > { %v4232_v18 = vpop.eup %4231  ;;  %4051 = vmatmul.mubr.msk.f32.vlgmr.msra.gmra.mxu0 %vm1069_vm3, %v2477_v14  ;;  %4064 = vmatpush3.msra.mxu1 %v2943_v38 }
 0x5dd   : > { %v4234_v39 = vpop.eup %4233  ;;  %4059 = vmatpush3.msra.mxu0 %v2867_v20  ;;  %4060 = vmatprep.mubr.msk.f32.mxu0 %vm4441_vm1, %v4440_v13  ;;  %v2483_v41 = vmul.f32 %v4232_v18, %v4216_v7 }
 0x5de   : > { %4065 = vmatprep.mubr.msk.f32.mxu1 %vm4441_vm1, %v4440_v13  ;;  %4068 = vmatprep.subr.mxu0 %v4440_v13  ;;  %v2481_v19 = vmul.f32 %v4234_v39, %v4962_v8 }
 0x5df   : > { %4066 = vmatmul.mubr.msk.f32.vlgmr.msra.gmra.mxu1 %vm1069_vm3, %v2483_v41  ;;  %4073 = vmatprep.subr.mxu1 %v3137_v50 }
 0x5e0   : > { %4061 = vmatmul.mubr.msk.f32.vlgmr.msra.gmra.mxu0 %vm1069_vm3, %v2481_v19  ;;  %4074 = vmatpush3.msra.mxu1 %v3137_v50 }
 0x5e1   : > { %v4236_v45 = vpop.eup %4235  ;;  %4069 = vmatpush3.msra.mxu0 %v3019_v44  ;;  %4070 = vmatprep.mubr.msk.f32.mxu0 %vm4441_vm1, %v4440_v13 }
 0x5e2   : > { %v2485_v47 = vmul.f32 %v4236_v45, %v4967_v11  ;;  %4075 = vmatprep.subr.mxu1 %v3136_v51 }
 0x5e3   : > { %4076 = vmatpush3.msra.mxu1 %v3136_v51 }
 0x5e4   : > { %4071 = vmatmul.mubr.msk.f32.vlgmr.msra.gmra.mxu0 %vm1069_vm3, %v2485_v47  ;;  %4077 = vmatprep.subr.mxu1 %v3135_v53 }
 0x5e5   : > { %4078 = vmatpush3.msra.mxu1 %v3135_v53 }
 0x5e6   : > { %4079 = vmatprep.subr.mxu1 %v3134_v56 }
 0x5e7   : > { %4080 = vmatpush3.msra.mxu1 %v3134_v56 }
 0x663   : > { %v2634_v54 = vpop.f32.mrf.mxu0 }
 0x664   : > { %3104 = vrot.lane.b32.xlu1 %v2634_v54, %s4447_s18 }
 0x665   : > { %v4042_v55 = vpop.f32.mrf.mxu0 }
 0x693   : > { %v2558_v13 = vpop.f32.mrf.mxu1 }
 0x694   : > { %3102 = vrot.lane.b32.xlu0 %v2558_v13, %s4447_s18 }
 0x695   : > { %v4037_v57 = vpop.f32.mrf.mxu1 }
 0x697   : > { %v2710_v58 = vpop.f32.mrf.mxu1 }
 0x698   : > { %3106 = vrot.lane.b32.xlu0 %v2710_v58, %s4447_s18 }
 0x699   : > { %v4047_v59 = vpop.f32.mrf.mxu1 }
 0x69b   : > { %v2862_v60 = vpop.f32.mrf.mxu1 }
 0x69c   : > { %v2786_v61 = vpop.f32.mrf.mxu0  ;;  %3110 = vrot.lane.b32.xlu0 %v2862_v60, %s4447_s18 }
 0x69d   : > { %3108 = vrot.lane.b32.xlu1 %v2786_v61, %s4447_s18  ;;  %v4057_v63 = vpop.f32.mrf.mxu1 }
 0x69e   : > { %v4052_v0 = vpop.f32.mrf.mxu0 }
 0x69f   : > { %v3014_v1 = vpop.f32.mrf.mxu1 }
 0x6a0   : > { %v2938_v2 = vpop.f32.mrf.mxu0  ;;  %3114 = vrot.lane.b32.xlu0 %v3014_v1, %s4447_s18  ;;  %v4448_v1 = vmov 0  }
 0x6a1   : > { %3112 = vrot.lane.b32.xlu1 %v2938_v2, %s4447_s18  ;;  %v4067_v3 = vpop.f32.mrf.mxu1  ;;  %4172 = vset.pattern.permute.xlu0 %v4448_v1  ;;  %v3799_v2 = vld [vmem:[#allocation2] ss:$0 sm:$0xff] }
 0x6a2   : > { %v4062_v4 = vpop.f32.mrf.mxu0  ;;  %4171 = vset.pattern.permute.xlu1 %v4448_v1 }
 0x6a4   : > { %v3090_v5 = vpop.f32.mrf.mxu0 }
 0x6a5   : > { %3116 = vrot.lane.b32.xlu1 %v3090_v5, %s4447_s18  ;;  %s4371_s18 = scalar_lea.vmem %s4370_s17, 256 }
 0x6a6   : > { %v4072_v6 = vpop.f32.mrf.mxu0  ;;  %p4373_p0 = scmp.lt.s32.totalorder %s4371_s18, %s4365_s15 }
 0x6a8   : > { %p4374_p10 = por %p4373_p0, %p4372_p13 }
 0x6aa   : > { %p4375_p3 = pnand %p4374_p10, %p4368_p12 }
 0x6d6   : > { %v3105_v7 = vpop.permute.xlu1 %3104 }
 0x6d7   : > { %v5008_v10 = vsel %vm447_vm2, %v4920_v43, %v3105_v7 }
 0x706   : > { %v3103_v8 = vpop.permute.xlu0 %3102 }
 0x707   : > { %v5004_v9 = vsel %vm447_vm2, %v4916_v40, %v3103_v8 }
 0x708   : > { %4081 = vmatprep.mubr.msk.f32.mxu1 %vm314_vm0, %v5004_v9 }
 0x709   : > { %4082 = vmatmul.mubr.msk.f32.vlgmr.msra.gmra.mxu1 %vm314_vm0, %v5008_v10 }
 0x70a   : > { %v3107_v11 = vpop.permute.xlu0 %3106 }
 0x70b   : > { %v5016_v12 = vsel %vm447_vm2, %v4918_v42, %v3107_v11 }
 0x70c   : > { %4084 = vmatprep.mubr.msk.f32.mxu1 %vm314_vm0, %v5016_v12 }
 0x70e   : > { %v3111_v40 = vpop.permute.xlu0 %3110 }
 0x70f   : > { %v5022_v22 = vsel %vm447_vm2, %v4924_v48, %v3111_v40  ;;  %v3109_v43 = vpop.permute.xlu1 %3108 }
 0x710   : > { %v5026_v23 = vsel %vm447_vm2, %v4922_v46, %v3109_v43 }
 0x711   : > { %4085 = vmatmul.mubr.msk.f32.gmra.mxu1 %vm314_vm0, %v5026_v23 }
 0x712   : > { %4087 = vmatprep.mubr.msk.f32.mxu1 %vm314_vm0, %v5022_v22  ;;  %v3115_v42 = vpop.permute.xlu0 %3114 }
 0x713   : > { %v5034_v24 = vsel %vm447_vm2, %v4931_v62, %v3115_v42  ;;  %v3113_v25 = vpop.permute.xlu1 %3112  ;;  %v3789_v62 = vld [vmem:[%s5162_s3] ss:$0 sm:$0xff] }
 0x714   : > { %v5038_v48 = vsel %vm447_vm2, %v4926_v49, %v3113_v25 }
 0x715   : > { %4088 = vmatmul.mubr.msk.f32.gmra.mxu1 %vm314_vm0, %v5038_v48 }
 0x716   : > { %4090 = vmatprep.mubr.msk.f32.mxu1 %vm314_vm0, %v5034_v24 }
 0x717   : > { %v3117_v46 = vpop.permute.xlu1 %3116 }
 0x718   : > { %v5046_v26 = vsel %vm447_vm2, %v4928_v52, %v3117_v46 }
 0x719   : > { %4091 = vmatmul.mubr.msk.f32.gmra.mxu1 %vm314_vm0, %v5046_v26 }
 0x7c9   : > { %v4083_v49 = vpop.f32.mrf.mxu1 }
 0x7ca   : > { %v3241_v27 = vadd.f32 %v4083_v49, %v3789_v62 }
 0x7cb   : > { %v3235_v20 = vpop.f32.mrf.mxu1 }
 0x7cc   : > { %4237 = vtanh.f32 %v3241_v27  ;;  %v3236_v28 = vadd.f32 %v3789_v62, %v3235_v20 }
 0x7ce   : > { %4239 = vtanh.f32 %v3236_v28 }
 0x7d1   : > { %v4086_v21 = vpop.f32.mrf.mxu1 }
 0x7d2   : > { %v3251_v29 = vadd.f32 %v4086_v21, %v3789_v62 }
 0x7d3   : > { %v3245_v30 = vpop.f32.mrf.mxu1 }
 0x7d4   : > { %4241 = vtanh.f32 %v3251_v29  ;;  %v3246_v31 = vadd.f32 %v3789_v62, %v3245_v30 }
 0x7d5   : > { %v4089_v52 = vpop.f32.mrf.mxu1 }
 0x7d6   : > { %4243 = vtanh.f32 %v3246_v31  ;;  %v3261_v32 = vadd.f32 %v4089_v52, %v3789_v62 }
 0x7d7   : > { %v3255_v33 = vpop.f32.mrf.mxu1 }
 0x7d8   : > { %4245 = vtanh.f32 %v3261_v32  ;;  %v3256_v35 = vadd.f32 %v3789_v62, %v3255_v33 }
 0x7d9   : > { %v4238_v15 = vpop.eup %4237  ;;  %v4092_v17 = vpop.f32.mrf.mxu1 }
 0x7da   : > { %4247 = vtanh.f32 %v3256_v35  ;;  %v3271_v16 = vadd.f32 %v4092_v17, %v3789_v62  ;;  %v3290_v36 = vmul.f32 %v4238_v15, %v3798_v34 }
 0x7db   : > { %v4240_v37 = vpop.eup %4239  ;;  %v3265_v14 = vpop.f32.mrf.mxu1 }
 0x7dc   : > { %4249 = vtanh.f32 %v3271_v16  ;;  %v3266_v38 = vadd.f32 %v3789_v62, %v3265_v14  ;;  %v3300_v18 = vsel %vm314_vm0, %v3290_v36, 0.0  ;;  %v3289_v39 = vmul.f32 %v4240_v37, %v3798_v34 }
 0x7dd   : > { %3301 = vadd.xlane.f32.xlu1 %v3300_v18 }
 0x7de   : > { %4251 = vtanh.f32 %v3266_v38  ;;  %v3297_v41 = vsel %vm314_vm0, %v3289_v39, 0.0 }
 0x7df   : > { %3298 = vadd.xlane.f32.xlu0 %v3297_v41 }
 0x7e1   : > { %v4242_v19 = vpop.eup %4241 }
 0x7e2   : > { %v3292_v44 = vmul.f32 %v4242_v19, %v3798_v34 }
 0x7e3   : > { %v4244_v45 = vpop.eup %4243 }
 0x7e4   : > { %v3306_v47 = vsel %vm314_vm0, %v3292_v44, 0.0  ;;  %v3291_v50 = vmul.f32 %v4244_v45, %v3798_v34 }
 0x7e5   : > { %v4246_v51 = vpop.eup %4245  ;;  %3307 = vadd.xlane.f32.xlu0 %v3306_v47 }
 0x7e6   : > { %v3303_v54 = vsel %vm314_vm0, %v3291_v50, 0.0  ;;  %v3294_v56 = vmul.f32 %v4246_v51, %v3798_v34 }
 0x7e7   : > { %v4248_v53 = vpop.eup %4247 }
 0x7e8   : > { %v3293_v55 = vmul.f32 %v4248_v53, %v3798_v34  ;;  %v3312_v59 = vsel %vm314_vm0, %v3294_v56, 0.0 }
 0x7e9   : > { %v4250_v13 = vpop.eup %4249  ;;  %3304 = vadd.xlane.f32.xlu0 %v3303_v54 }
 0x7ea   : > { %v3309_v57 = vsel %vm314_vm0, %v3293_v55, 0.0  ;;  %v3296_v61 = vmul.f32 %v4250_v13, %v3798_v34 }
 0x7eb   : > { %v4252_v58 = vpop.eup %4251  ;;  %3310 = vadd.xlane.f32.xlu1 %v3309_v57 }
 0x7ec   : > { %v3295_v60 = vmul.f32 %v4252_v58, %v3798_v34  ;;  %v3318_v0 = vsel %vm314_vm0, %v3296_v61, 0.0 }
 0x7ed   : > { %3313 = vadd.xlane.f32.xlu0 %v3312_v59 }
 0x7ee   : > { %v3315_v63 = vsel %vm314_vm0, %v3295_v60, 0.0 }
 0x7ef   : > { %3316 = vadd.xlane.f32.xlu1 %v3315_v63 }
 0x7f1   : > { %3319 = vadd.xlane.f32.xlu0 %v3318_v0 }
 0x866   : > { %v3302_v3 = vpop.xlane.xlu1 %3301 }
 0x867   : > { %v3329_v4 = vadd.f32 %v3799_v2, %v3302_v3 }
 0x868   : > { %v3299_v5 = vpop.xlane.xlu0 %3298 }
 0x869   : > { %v3344_v6 = vsel %vm3336_vm4, %v3329_v4, -inf  ;;  %v3328_v7 = vadd.f32 %v3799_v2, %v3299_v5 }
 0x86a   : > { %v3345_v8 = vrot.slane %v3344_v6, 4 }
 0x86b   : > { %v3337_v11 = vsel %vm3336_vm4, %v3328_v7, -inf }
 0x86c   : > { %v3346_v40 = vmax.f32 %v3344_v6, %v3345_v8  ;;  %v3338_v43 = vrot.slane %v3337_v11, 4 }
 0x86e   : > { %v3347_v42 = vrot.slane %v3346_v40, 2  ;;  %v3339_v25 = vmax.f32 %v3337_v11, %v3338_v43  ;;  %v3308_v46 = vpop.xlane.xlu0 %3307 }
 0x86f   : > { %v3331_v62 = vadd.f32 %v3799_v2, %v3308_v46 }
 0x870   : > { %v3348_v49 = vmax.f32 %v3346_v40, %v3347_v42  ;;  %v3340_v27 = vrot.slane %v3339_v25, 2 }
 0x871   : > { %v3358_v20 = vsel %vm3336_vm4, %v3331_v62, -inf }
 0x872   : > { %v3349_v28 = vrot.slane %v3348_v49, 1  ;;  %v3341_v21 = vmax.f32 %v3339_v25, %v3340_v27  ;;  %v3359_v29 = vrot.slane %v3358_v20, 4  ;;  %v3305_v30 = vpop.xlane.xlu0 %3304 }
 0x873   : > { %v3330_v31 = vadd.f32 %v3799_v2, %v3305_v30 }
 0x874   : > { %v3350_v52 = vmax.f32 %v3348_v49, %v3349_v28  ;;  %v3342_v32 = vrot.slane %v3341_v21, 1  ;;  %v3360_v33 = vmax.f32 %v3358_v20, %v3359_v29  ;;  %v3311_v34 = vpop.xlane.xlu1 %3310 }
 0x875   : > { %v3351_v35 = vsel %vm3336_vm4, %v3330_v31, -inf  ;;  %v3332_v15 = vadd.f32 %v3799_v2, %v3311_v34 }
 0x876   : > { %v3394_v17 = vsub.f32 %v3329_v4, %v3350_v52  ;;  %v3343_v16 = vmax.f32 %v3341_v21, %v3342_v32  ;;  %v3361_v36 = vrot.slane %v3360_v33, 2  ;;  %v3352_v37 = vrot.slane %v3351_v35, 4  ;;  %v3314_v14 = vpop.xlane.xlu0 %3313 }
 0x877   : > { %v3365_v38 = vsel %vm3336_vm4, %v3332_v15, -inf  ;;  %v3333_v18 = vadd.f32 %v3799_v2, %v3314_v14 }
 0x878   : > { %v3403_v39 = vmul.f32 1.442695, %v3394_v17  ;;  %v3393_v41 = vsub.f32 %v3328_v7, %v3343_v16  ;;  %v3362_v19 = vmax.f32 %v3360_v33, %v3361_v36  ;;  %v3353_v44 = vmax.f32 %v3351_v35, %v3352_v37  ;;  %v3317_v45 = vpop.xlane.xlu1 %3316 }
 0x879   : > { %v3366_v47 = vrot.slane %v3365_v38, 4  ;;  %v3372_v50 = vsel %vm3336_vm4, %v3333_v18, -inf  ;;  %v3334_v51 = vadd.f32 %v3799_v2, %v3317_v45 }
 0x87a   : > { %4253 = vpow2.f32 %v3403_v39  ;;  %v3401_v53 = vmul.f32 1.442695, %v3393_v41  ;;  %v3363_v54 = vrot.slane %v3362_v19, 1  ;;  %v3354_v55 = vrot.slane %v3353_v44, 2  ;;  %v3320_v56 = vpop.xlane.xlu0 %3319 }
 0x87b   : > { %v3367_v13 = vmax.f32 %v3365_v38, %v3366_v47  ;;  %v3373_v57 = vrot.slane %v3372_v50, 4  ;;  %v3379_v58 = vsel %vm3336_vm4, %v3334_v51, -inf  ;;  %v3335_v59 = vadd.f32 %v3799_v2, %v3320_v56 }
 0x87c   : > { %4255 = vpow2.f32 %v3401_v53  ;;  %v3364_v60 = vmax.f32 %v3362_v19, %v3363_v54  ;;  %v3355_v61 = vmax.f32 %v3353_v44, %v3354_v55  ;;  %v3380_v63 = vrot.slane %v3379_v58, 4 }
 0x87d   : > { %v3368_v0 = vrot.slane %v3367_v13, 2  ;;  %v3374_v1 = vmax.f32 %v3372_v50, %v3373_v57  ;;  %v3386_v3 = vsel %vm3336_vm4, %v3335_v59, -inf }
 0x87e   : > { %v3396_v4 = vsub.f32 %v3331_v62, %v3364_v60  ;;  %v3356_v5 = vrot.slane %v3355_v61, 1  ;;  %v3381_v6 = vmax.f32 %v3379_v58, %v3380_v63  ;;  %v3387_v7 = vrot.slane %v3386_v3, 4 }
 0x87f   : > { %v3369_v8 = vmax.f32 %v3367_v13, %v3368_v0  ;;  %v3375_v11 = vrot.slane %v3374_v1, 2 }
 0x880   : > { %v3407_v40 = vmul.f32 1.442695, %v3396_v4  ;;  %v3357_v43 = vmax.f32 %v3355_v61, %v3356_v5  ;;  %v3382_v42 = vrot.slane %v3381_v6, 2  ;;  %v3388_v25 = vmax.f32 %v3386_v3, %v3387_v7 }
 0x881   : > { %v3370_v46 = vrot.slane %v3369_v8, 1  ;;  %v3376_v2 = vmax.f32 %v3374_v1, %v3375_v11 }
 0x882   : > { %4257 = vpow2.f32 %v3407_v40  ;;  %v3395_v49 = vsub.f32 %v3330_v31, %v3357_v43  ;;  %v3383_v27 = vmax.f32 %v3381_v6, %v3382_v42  ;;  %v3389_v20 = vrot.slane %v3388_v25, 2 }
 0x883   : > { %v3371_v28 = vmax.f32 %v3369_v8, %v3370_v46  ;;  %v3377_v21 = vrot.slane %v3376_v2, 1 }
 0x884   : > { %v3405_v29 = vmul.f32 1.442695, %v3395_v49  ;;  %v3384_v30 = vrot.slane %v3383_v27, 1  ;;  %v3390_v62 = vmax.f32 %v3388_v25, %v3389_v20 }
 0x885   : > { %v3397_v52 = vsub.f32 %v3332_v15, %v3371_v28  ;;  %v3378_v32 = vmax.f32 %v3376_v2, %v3377_v21 }
 0x886   : > { %4259 = vpow2.f32 %v3405_v29  ;;  %v3385_v33 = vmax.f32 %v3383_v27, %v3384_v30  ;;  %v3391_v34 = vrot.slane %v3390_v62, 1 }
 0x887   : > { %v5072_v35 = vpop.eup %4253  ;;  %v3409_v17 = vmul.f32 1.442695, %v3397_v52  ;;  %v3398_v16 = vsub.f32 %v3333_v18, %v3378_v32 }
 0x888   : > { %v3424_v36 = vsel %vm3336_vm4, %v5072_v35, 0.0  ;;  %v3399_v31 = vsub.f32 %v3334_v51, %v3385_v33  ;;  %v3392_v37 = vmax.f32 %v3390_v62, %v3391_v34 }
 0x889   : > { %v5076_v14 = vpop.eup %4255  ;;  %v3425_v38 = vrot.slane %v3424_v36, 4  ;;  %4261 = vpow2.f32 %v3409_v17  ;;  %v3411_v39 = vmul.f32 1.442695, %v3398_v16 }
 0x88a   : > { %v3417_v15 = vsel %vm3336_vm4, %v5076_v14, 0.0  ;;  %v3413_v41 = vmul.f32 1.442695, %v3399_v31  ;;  %v3400_v19 = vsub.f32 %v3335_v59, %v3392_v37 }
 0x88b   : > { %v3426_v44 = vadd.f32 %v3425_v38, %v3424_v36  ;;  %v3418_v45 = vrot.slane %v3417_v15, 4  ;;  %4263 = vpow2.f32 %v3411_v39 }
 0x88c   : > { %4265 = vpow2.f32 %v3413_v41  ;;  %v3415_v18 = vmul.f32 1.442695, %v3400_v19 }
 0x88d   : > { %v3427_v47 = vrot.slane %v3426_v44, 2  ;;  %v3419_v50 = vadd.f32 %v3418_v45, %v3417_v15 }
 0x88e   : > { %4267 = vpow2.f32 %v3415_v18 }
 0x88f   : > { %v5080_v51 = vpop.eup %4257  ;;  %v3420_v53 = vrot.slane %v3419_v50, 2  ;;  %v3428_v54 = vadd.f32 %v3427_v47, %v3426_v44 }
 0x890   : > { %v3438_v55 = vsel %vm3336_vm4, %v5080_v51, 0.0 }
 0x891   : > { %v3439_v56 = vrot.slane %v3438_v55, 4  ;;  %v3429_v13 = vrot.slane %v3428_v54, 1  ;;  %v3421_v57 = vadd.f32 %v3420_v53, %v3419_v50 }
 0x893   : > { %v5084_v58 = vpop.eup %4259  ;;  %v3440_v59 = vadd.f32 %v3439_v56, %v3438_v55  ;;  %v3430_v60 = vadd.f32 %v3429_v13, %v3428_v54  ;;  %v3422_v61 = vrot.slane %v3421_v57, 1 }
 0x894   : > { %v3431_v63 = vsel %vm3336_vm4, %v5084_v58, 0.0 }
 0x895   : > { %v3441_v0 = vrot.slane %v3440_v59, 2  ;;  %v3432_v1 = vrot.slane %v3431_v63, 4  ;;  %4269 = vrcp.f32 %v3430_v60  ;;  %v3423_v3 = vadd.f32 %v3422_v61, %v3421_v57 }
 0x896   : > { %v5088_v4 = vpop.eup %4261 }
 0x897   : > { %v3433_v5 = vadd.f32 %v3432_v1, %v3431_v63  ;;  %v3445_v6 = vsel %vm3336_vm4, %v5088_v4, 0.0  ;;  %4271 = vrcp.f32 %v3423_v3  ;;  %v3442_v7 = vadd.f32 %v3441_v0, %v3440_v59 }
 0x898   : > { %v4264_v8 = vpop.eup %4263  ;;  %v3446_v11 = vrot.slane %v3445_v6, 4 }
 0x899   : > { %v4266_v40 = vpop.eup %4265  ;;  %v3434_v43 = vrot.slane %v3433_v5, 2  ;;  %v3452_v42 = vsel %vm3336_vm4, %v4264_v8, 0.0  ;;  %v3443_v25 = vrot.slane %v3442_v7, 1 }
 0x89a   : > { %v3447_v46 = vadd.f32 %v3446_v11, %v3445_v6  ;;  %v3453_v2 = vrot.slane %v3452_v42, 4  ;;  %v3459_v49 = vsel %vm3336_vm4, %v4266_v40, 0.0 }
 0x89b   : > { %v4268_v27 = vpop.eup %4267  ;;  %v3460_v20 = vrot.slane %v3459_v49, 4  ;;  %v3444_v28 = vadd.f32 %v3443_v25, %v3442_v7  ;;  %v3435_v21 = vadd.f32 %v3434_v43, %v3433_v5 }
 0x89c   : > { %v3448_v29 = vrot.slane %v3447_v46, 2  ;;  %v3454_v30 = vadd.f32 %v3453_v2, %v3452_v42  ;;  %v3466_v62 = vsel %vm3336_vm4, %v4268_v27, 0.0 }
 0x89d   : > { %v3461_v52 = vadd.f32 %v3460_v20, %v3459_v49  ;;  %v3467_v32 = vrot.slane %v3466_v62, 4  ;;  %4273 = vrcp.f32 %v3444_v28  ;;  %v3436_v33 = vrot.slane %v3435_v21, 1 }
 0x89e   : > { %v3455_v34 = vrot.slane %v3454_v30, 2  ;;  %v3449_v17 = vadd.f32 %v3448_v29, %v3447_v46 }
 0x89f   : > { %v3462_v16 = vrot.slane %v3461_v52, 2  ;;  %v3468_v36 = vadd.f32 %v3467_v32, %v3466_v62  ;;  %v3437_v31 = vadd.f32 %v3436_v33, %v3435_v21 }
 0x8a0   : > { %v3456_v37 = vadd.f32 %v3455_v34, %v3454_v30  ;;  %v3450_v38 = vrot.slane %v3449_v17, 1 }
 0x8a1   : > { %v3469_v39 = vrot.slane %v3468_v36, 2  ;;  %4275 = vrcp.f32 %v3437_v31  ;;  %v3463_v15 = vadd.f32 %v3462_v16, %v3461_v52 }
 0x8a2   : > { %v4270_v41 = vpop.eup %4269  ;;  %v3457_v19 = vrot.slane %v3456_v37, 1  ;;  %v3451_v50 = vadd.f32 %v3450_v38, %v3449_v17 }
 0x8a3   : > { %v3476_v44 = vmul.f32 %v4270_v41, %v5072_v35  ;;  %v3470_v18 = vadd.f32 %v3469_v39, %v3468_v36  ;;  %v3464_v53 = vrot.slane %v3463_v15, 1 }
 0x8a4   : > { %v4272_v45 = vpop.eup %4271  ;;  %v3458_v47 = vadd.f32 %v3457_v19, %v3456_v37 }
 0x8a5   : > { %3496 = vperm.xlu0 %4172, %v3476_v44   ;;  %v3474_v54 = vmul.f32 %v4272_v45, %v5076_v14  ;;  %v3471_v55 = vrot.slane %v3470_v18, 1  ;;  %v3465_v56 = vadd.f32 %v3464_v53, %v3463_v15 }
 0x8a6   : > { %4277 = vrcp.f32 %v3458_v47 }
 0x8a7   : > { %3491 = vperm.xlu1 %4171, %v3474_v54   ;;  %4279 = vrcp.f32 %v3451_v50  ;;  %v3472_v59 = vadd.f32 %v3471_v55, %v3470_v18 }
 0x8a8   : > { %4281 = vrcp.f32 %v3465_v56 }
 0x8a9   : > { %4283 = vrcp.f32 %v3472_v59 }
 0x8aa   : > { %v4274_v13 = vpop.eup %4273 }
 0x8ab   : > { %v3480_v57 = vmul.f32 %v4274_v13, %v5080_v51 }
 0x8ad   : > { %3506 = vperm.xlu1 %4171, %v3480_v57  }
 0x8ae   : > { %v4276_v35 = vpop.eup %4275 }
 0x8af   : > { %v3478_v60 = vmul.f32 %v4276_v35, %v5084_v58 }
 0x8b1   : > { %3501 = vperm.xlu1 %4171, %v3478_v60  }
 0x8b3   : > { %v4278_v61 = vpop.eup %4277 }
 0x8b4   : > { %v3484_v63 = vmul.f32 %v4278_v61, %v4264_v8  ;;  %v4280_v0 = vpop.eup %4279 }
 0x8b5   : > { %v3482_v14 = vmul.f32 %v4280_v0, %v5088_v4  ;;  %v4282_v1 = vpop.eup %4281 }
 0x8b6   : > { %3516 = vperm.xlu1 %4171, %v3484_v63   ;;  %v3486_v3 = vmul.f32 %v4282_v1, %v4266_v40  ;;  %v4284_v5 = vpop.eup %4283 }
 0x8b7   : > { %v3488_v51 = vmul.f32 %v4284_v5, %v4268_v27 }
 0x8ba   : > { %3511 = vperm.xlu1 %4171, %v3482_v14  }
 0x8be   : > { %3521 = vperm.xlu1 %4171, %v3486_v3  }
 0x8c2   : > { %3526 = vperm.xlu1 %4171, %v3488_v51  }
 0x920   : > { %v3497_v6 = vpop.permute.xlu0 %3496 }
 0x921   : > { %v3530_v58 = vmul.f32 %v3497_v6, %v5008_v10 }
 0x922   : > { %v3492_v7 = vpop.permute.xlu1 %3491 }
 0x923   : > { %v3529_v11 = vmul.f32 %v3492_v7, %v5004_v9  ;;  %v3544_v42 = vsel %vm314_vm0, %v3530_v58, 0.0 }
 0x924   : > { %v3545_v46 = vrot.slane %v3544_v42, 4 }
 0x925   : > { %v3537_v43 = vsel %vm314_vm0, %v3529_v11, 0.0 }
 0x926   : > { %v3538_v25 = vrot.slane %v3537_v43, 4  ;;  %v3546_v9 = vadd.f32 %v3545_v46, %v3544_v42 }
 0x928   : > { %v3507_v8 = vpop.permute.xlu1 %3506  ;;  %v3539_v27 = vadd.f32 %v3538_v25, %v3537_v43  ;;  %v3547_v52 = vrot.slane %v3546_v9, 2 }
 0x929   : > { %v3532_v4 = vmul.f32 %v3507_v8, %v5026_v23 }
 0x92a   : > { %v3540_v62 = vrot.slane %v3539_v27, 2  ;;  %v3548_v36 = vadd.f32 %v3547_v52, %v3546_v9 }
 0x92b   : > { %v3558_v2 = vsel %vm314_vm0, %v3532_v4, 0.0 }
 0x92c   : > { %v3502_v40 = vpop.permute.xlu1 %3501  ;;  %v3559_v28 = vrot.slane %v3558_v2, 4  ;;  %v3541_v16 = vadd.f32 %v3540_v62, %v3539_v27  ;;  %v3549_v45 = vrot.slane %v3548_v36, 1 }
 0x92d   : > { %v3531_v49 = vmul.f32 %v3502_v40, %v5016_v12 }
 0x92e   : > { %v3560_v23 = vadd.f32 %v3559_v28, %v3558_v2  ;;  %v3542_v19 = vrot.slane %v3541_v16, 1 }
 0x92f   : > { %v3551_v20 = vsel %vm314_vm0, %v3531_v49, 0.0 }
 0x930   : > { %v3552_v10 = vrot.slane %v3551_v20, 4  ;;  %v3561_v31 = vrot.slane %v3560_v23, 2  ;;  %v3543_v13 = vadd.f32 %v3542_v19, %v3541_v16 }
 0x931   : > { %v3517_v21 = vpop.permute.xlu1 %3516 }
 0x932   : > { %v3553_v29 = vadd.f32 %v3552_v10, %v3551_v20  ;;  %v3534_v30 = vmul.f32 %v3517_v21, %v5038_v48  ;;  %v3562_v18 = vadd.f32 %v3561_v31, %v3560_v23 }
 0x934   : > { %v3554_v32 = vrot.slane %v3553_v29, 2  ;;  %v3572_v33 = vsel %vm314_vm0, %v3534_v30, 0.0  ;;  %v3563_v35 = vrot.slane %v3562_v18, 1 }
 0x935   : > { %v3573_v34 = vrot.slane %v3572_v33, 4  ;;  %v3512_v17 = vpop.permute.xlu1 %3511 }
 0x936   : > { %v3533_v12 = vmul.f32 %v3512_v17, %v5022_v22  ;;  %v3555_v37 = vadd.f32 %v3554_v32, %v3553_v29  ;;  %v3564_v7 = vadd.f32 %v3563_v35, %v3562_v18 }
 0x937   : > { %v3574_v39 = vadd.f32 %v3573_v34, %v3572_v33 }
 0x938   : > { %v3565_v38 = vsel %vm314_vm0, %v3533_v12, 0.0  ;;  %v3556_v47 = vrot.slane %v3555_v37, 1 }
 0x939   : > { %v3566_v15 = vrot.slane %v3565_v38, 4  ;;  %v3522_v41 = vpop.permute.xlu1 %3521  ;;  %v3575_v53 = vrot.slane %v3574_v39, 2 }
 0x93a   : > { %v3535_v48 = vmul.f32 %v3522_v41, %v5034_v24  ;;  %v3550_v24 = vadd.f32 %v3549_v45, %v3548_v36  ;;  %v3557_v60 = vadd.f32 %v3556_v47, %v3555_v37 }
 0x93b   : > { %v3567_v44 = vadd.f32 %v3566_v15, %v3565_v38  ;;  %v3576_v63 = vadd.f32 %v3575_v53, %v3574_v39 }
 0x93c   : > { %v3579_v50 = vsel %vm314_vm0, %v3535_v48, 0.0  ;;  %v3602_v3 = vsel %vm3601_vm5, %v3550_v24, %v3543_v13 }
 0x93d   : > { %v3568_v22 = vrot.slane %v3567_v44, 2  ;;  %v3580_v54 = vrot.slane %v3579_v50, 4  ;;  %v3527_v55 = vpop.permute.xlu1 %3526  ;;  %v3604_v6 = vsel %vm3603_vm6, %v3557_v60, %v3602_v3  ;;  %v3577_v11 = vrot.slane %v3576_v63, 1 }
 0x93e   : > { %v3536_v56 = vmul.f32 %v3527_v55, %v5046_v26  ;;  %v3606_v8 = vsel %vm3605_vm7, %v3564_v7, %v3604_v6 }
 0x93f   : > { %v3569_v57 = vadd.f32 %v3568_v22, %v3567_v44  ;;  %v3581_v59 = vadd.f32 %v3580_v54, %v3579_v50  ;;  %v3578_v46 = vadd.f32 %v3577_v11, %v3576_v63 }
 0x940   : > { %v3586_v61 = vsel %vm314_vm0, %v3536_v56, 0.0 }
 0x941   : > { %v3570_v0 = vrot.slane %v3569_v57, 1  ;;  %v3582_v14 = vrot.slane %v3581_v59, 2  ;;  %v3587_v1 = vrot.slane %v3586_v61, 4 }
 0x943   : > { %v3583_v5 = vadd.f32 %v3582_v14, %v3581_v59  ;;  %v3588_v51 = vadd.f32 %v3587_v1, %v3586_v61  ;;  %v3571_v26 = vadd.f32 %v3570_v0, %v3569_v57 }
 0x945   : > { %v3584_v58 = vrot.slane %v3583_v5, 1  ;;  %v3589_v43 = vrot.slane %v3588_v51, 2  ;;  %v3608_v4 = vsel %vm3607_vm8, %v3571_v26, %v3606_v8 }
 0x946   : > { %v3610_v49 = vsel %vm3609_vm9, %v3578_v46, %v3608_v4 }
 0x947   : > { %v3590_v42 = vadd.f32 %v3589_v43, %v3588_v51  ;;  %v3585_v25 = vadd.f32 %v3584_v58, %v3583_v5 }
 0x949   : > { %v3591_v40 = vrot.slane %v3590_v42, 1  ;;  %v3612_v27 = vsel %vm3611_vm10, %v3585_v25, %v3610_v49 }
 0x94b   : > { %v3592_v2 = vadd.f32 %v3591_v40, %v3590_v42 }
 0x94d   : > { %v3614_v20 = vsel %vm3613_vm11, %v3592_v2, %v3612_v27 }
 0x94e   : > { %3616 = vst.msk [vmem:[%s300_s13] sm:$0xff] %vm314_vm0, %v3614_v20 }
 0x94f   : > { %4378 = shalt.err (!%p4375_p3)
}
 0x950   : > { %s4379_s19 = scalar_lea.hbm %s5121_s30, 128  ;;  %s4383_s8 = scalar_lea.hbm %s5165_s6, 256 }
 0x951   : > { %p4380_p11 = scmp.ne.s32.totalorder %s5121_s30, %s4379_s19  ;;  %p4384_p4 = scmp.lt.s32.totalorder %s5121_s30, %s5165_s6 }
 0x952   : > { %p4385_p6 = scmp.lt.s32.totalorder %s4383_s8, %s4379_s19 }
 0x953   : > { %p4381_p9 = pnand %p4380_p11, %p5182_p2 }
 0x954   : > { %p4386_p8 = por %p4385_p6, %p4384_p4 }
 0x955   : > { %p4382_p1 = pneg %p4381_p9 }
 0x957   : > { %p4387_p5 = pnand %p4386_p8, %p4382_p1 }
 0x959   : > { %4390 = shalt.err (!%p4387_p5)
}
 0x95a   : > { %4103 = dma.vmem_to_hbm [thread:$0]  (%p5182_p2), %s3632_s9, 128, %s5121_s30, %s3618_s14  }
 0x95b PF: > { %s3643_s21 = sand.u32 1, %s4421_s23   ;;  %p5183_p7 = scmp.ne.s32.totalorder %s5172_s29, 0 }
 0x95c   : > { %p5184_p12 = scmp.ge.s32.totalorder %s4433_s26, 2  ;;  %s3644_s13 = scalar_lea.sflag [#allocation5], %s3643_s21 }
 0x95e   : > { %p4117_p13 = pnand %p5184_p12, %p5183_p7 }
 0x960   : > { %p4118_p0 = pneg %p4117_p13 }
 0x962   : > { %4416 = dma.done.wait (%p4118_p0), %s3644_s13, 128  }
 0x963   : > { %4418 = vsyncadd (%p4118_p0), %s3644_s13, 4294967168  ;;  %p22_p10 = scmp.ge.s32.totalorder %s4566_s20, 4   ;;  %s5185_s23 = smov %s4425_s24 }
 0x964   : > { %s5186_s24 = smov %s4429_s25  ;;  %s5187_s25 = smov %s4582_s7 }
 0x965   : > { %s5188_s26 = smov %s4566_s20  ;;  %24 = sbr.rel (!%p22_p10) target bundleno = 9 (0x9), region = 97 }
 0x96a   :  { %3649 = vsyncpa [#allocation4], 1 }
 0x96b   :  { %3651 = vsyncpa [#allocation4 + $0x1], 1 }
 0x96c   :  { %3652 = vsyncpa [#allocation7], 1 }
 0x96d   :  { %3653 = vsyncpa [#allocation5], 1 }
 0x96e   :  { %3655 = vsyncpa [#allocation5 + $0x1], 1 }

</bundles_post_ra>
